<compile_context>
chip_gen: v7x
topology: tpu7x:2x2x1
jax: 0.10.0
libtpu: 0.0.40
codegen_flags: <defaults>
</compile_context>

<pallas_src>
import functools
import math

import jax
import jax.numpy as jnp
from jax.experimental import pallas as pl
from jax.experimental.pallas import tpu as pltpu


# --------------------------------------------------------------------------- kernel
def _tnp_fused_kernel(zin_ref,
                      xyw1_ref, xyb1_ref, xyw2_ref, xyb2_ref,
                      ln1g_ref, ln1b_ref, wqkv_ref, bqkv_ref, wo_ref, bo_ref,
                      ln2g_ref, ln2b_ref, w1_ref, b1_ref, w2_ref, b2_ref,
                      o_ref, *, num_heads, nc, eps):
    l = pl.program_id(1)

    def bdot(a, b):
        # bf16 operands (MXU-native), f32 accumulation.
        return jnp.dot(a.astype(jnp.bfloat16), b.astype(jnp.bfloat16),
                       preferred_element_type=jnp.float32)

    # ---- xy_encoder MLP, fused into layer-0 step; result seeds the VMEM-resident z.
    @pl.when(l == 0)
    def _():
        x = zin_ref[0].astype(jnp.float32)                     # (n, din)
        h = bdot(x, xyw1_ref[...]) + xyb1_ref[...]
        h = jnp.maximum(h, 0.0)
        z0 = bdot(h, xyw2_ref[...]) + xyb2_ref[...]
        o_ref[0] = z0.astype(o_ref.dtype)

    z = o_ref[0].astype(jnp.float32)                           # (n, dz), VMEM resident
    n, dz = z.shape
    dh = dz // num_heads

    def layernorm(x, g, b):
        mu = jnp.mean(x, axis=-1, keepdims=True)
        xc = x - mu
        var = jnp.mean(xc * xc, axis=-1, keepdims=True)
        return xc * jax.lax.rsqrt(var + eps) * g + b

    # ---- masked multi-head self-attention (pre-LN), fused QKV projection.
    h1 = layernorm(z, ln1g_ref[0], ln1b_ref[0])
    qkv = bdot(h1, wqkv_ref[0]) + bqkv_ref[0]                  # (n, 3*dz)
    q = qkv[:, :dz]           # 1/sqrt(dh) already folded into wqkv/bqkv q-columns
    k = qkv[:, dz:2 * dz]
    v = qkv[:, 2 * dz:]

    # TNP mask generated in-kernel (bool, no HBM/VMEM mask traffic):
    #   context queries: causal over earlier context; target queries: all context + self.
    row = jax.lax.broadcasted_iota(jnp.int32, (n, n), 0)
    col = jax.lax.broadcasted_iota(jnp.int32, (n, n), 1)
    is_ctx_q = row < nc
    is_ctx_k = col < nc
    mask = (is_ctx_q & is_ctx_k & (col <= row)) | ((~is_ctx_q) & (is_ctx_k | (col == row)))

    heads = []
    for hd in range(num_heads):           # small static head count; one s/p pair live/iter
        sl = slice(hd * dh, (hd + 1) * dh)
        s = jax.lax.dot_general(q[:, sl].astype(jnp.bfloat16),
                                k[:, sl].astype(jnp.bfloat16),
                                (((1,), (1,)), ((), ())),
                                preferred_element_type=jnp.float32)      # (n, n)
        s = jnp.where(mask, s, -1e9)
        s = s - jnp.max(s, axis=-1, keepdims=True)
        p = jnp.exp(s)
        p = p * pl.reciprocal(jnp.sum(p, axis=-1, keepdims=True), approx=True)
        heads.append(bdot(p, v[:, sl]))                                   # (n, dh)

    attn = jnp.concatenate(heads, axis=-1)                                # (n, dz)
    z = z + bdot(attn, wo_ref[0]) + bo_ref[0]        # single K=dz output projection

    # ---- feed-forward (pre-LN) with fused residual.
    h2 = layernorm(z, ln2g_ref[0], ln2b_ref[0])
    f = bdot(h2, w1_ref[0]) + b1_ref[0]
    f = jnp.maximum(f, 0.0)
    z = z + bdot(f, w2_ref[0]) + b2_ref[0]

    o_ref[0] = z.astype(o_ref.dtype)


# --------------------------------------------------------------------- param packing
def _stack_layer_params(layers, dz, num_heads):
    """Stack per-layer params to (L, ...) and fold 1/sqrt(dh) into q-columns of wqkv."""
    def stk(name):
        return jnp.stack([ly[name] for ly in layers], axis=0)

    scale = 1.0 / math.sqrt(dz // num_heads)
    wqkv = stk("wqkv")                                   # (L, dz, 3*dz)
    bqkv = stk("bqkv")                                   # (L, 3*dz)
    wqkv = wqkv.at[:, :, :dz].multiply(scale)            # one-time weight constant fold
    bqkv = bqkv.at[:, :dz].multiply(scale)

    return {
        "ln1_g": stk("ln1_g")[:, None, :], "ln1_b": stk("ln1_b")[:, None, :],
        "wqkv": wqkv, "bqkv": bqkv[:, None, :],
        "wo": stk("wo"), "bo": stk("bo")[:, None, :],
        "ln2_g": stk("ln2_g")[:, None, :], "ln2_b": stk("ln2_b")[:, None, :],
        "w1": stk("w1"), "b1": stk("b1")[:, None, :],
        "w2": stk("w2"), "b2": stk("b2")[:, None, :],
    }


# ------------------------------------------------------------------------ model glue
def tnp_encoder_masked_forward(params, cfg, xc, yc, xt):
    m, nc, _ = xc.shape
    dy = yc.shape[2]
    nt = xt.shape[1]
    n = nc + nt
    dtype = xc.dtype

    # _preprocess_context: cat(xc, cat(yc, 0-flag)); _preprocess_targets: cat(xt, cat(0s, 1-flag)).
    # x_encoder / y_encoder are Identity in this configuration.
    zc_in = jnp.concatenate([xc, yc, jnp.zeros((m, nc, 1), dtype)], axis=-1)
    zt_in = jnp.concatenate(
        [xt, jnp.zeros((m, nt, dy), dtype), jnp.ones((m, nt, 1), dtype)], axis=-1)
    z_in = jnp.concatenate([zc_in, zt_in], axis=1)          # (m, n, din)
    din = z_in.shape[-1]

    num_heads = cfg["num_heads"]
    dz = params["xy_w2"].shape[1]
    L = len(params["layers"])
    stacked = _stack_layer_params(params["layers"], dz, num_heads)

    kern = functools.partial(_tnp_fused_kernel, num_heads=num_heads, nc=nc, eps=1e-5)

    def per_layer(arr):
        # One layer's weights per grid step along the "arbitrary" layer axis.
        return pl.BlockSpec((1,) + arr.shape[1:], lambda b, l: (l, 0, 0))

    def const2d(shape):
        return pl.BlockSpec(shape, lambda b, l: (0, 0))

    out = pl.pallas_call(
        kern,
        out_shape=jax.ShapeDtypeStruct((m, n, dz), dtype),
        grid=(m, L),
        in_specs=[
            pl.BlockSpec((1, n, din), lambda b, l: (b, 0, 0)),           # raw tokens
            const2d((din, dz)), const2d((1, dz)),                         # xy w1 / b1
            const2d((dz, dz)), const2d((1, dz)),                          # xy w2 / b2
            per_layer(stacked["ln1_g"]), per_layer(stacked["ln1_b"]),
            per_layer(stacked["wqkv"]), per_layer(stacked["bqkv"]),
            per_layer(stacked["wo"]), per_layer(stacked["bo"]),
            per_layer(stacked["ln2_g"]), per_layer(stacked["ln2_b"]),
            per_layer(stacked["w1"]), per_layer(stacked["b1"]),
            per_layer(stacked["w2"]), per_layer(stacked["b2"]),
        ],
        # Constant over the layer axis -> z is VMEM-resident across all L layers and
        # is written back to HBM only once per batch row.
        out_specs=pl.BlockSpec((1, n, dz), lambda b, l: (b, 0, 0)),
        compiler_params=pltpu.CompilerParams(
            dimension_semantics=("parallel", "arbitrary")),
    )(z_in,
      params["xy_w1"], params["xy_b1"].reshape(1, dz),
      params["xy_w2"], params["xy_b2"].reshape(1, dz),
      stacked["ln1_g"], stacked["ln1_b"],
      stacked["wqkv"], stacked["bqkv"],
      stacked["wo"], stacked["bo"],
      stacked["ln2_g"], stacked["ln2_b"],
      stacked["w1"], stacked["b1"],
      stacked["w2"], stacked["b2"])
    return out                                              # [m, n, dz]


def init_params(key, dx, dy, dz, num_heads, num_layers, dff):
    din = dx + dy + 1
    keys = iter(jax.random.split(key, 2 + num_layers * 5))

    def dense(k, a, b):
        return 0.02 * jax.random.normal(k, (a, b), jnp.float32)

    params = {
        "xy_w1": dense(next(keys), din, dz), "xy_b1": jnp.zeros((dz,), jnp.float32),
        "xy_w2": dense(next(keys), dz, dz),  "xy_b2": jnp.zeros((dz,), jnp.float32),
        "layers": [],
    }
    for _ in range(num_layers):
        layer = {
            "ln1_g": jnp.ones((dz,), jnp.float32), "ln1_b": jnp.zeros((dz,), jnp.float32),
            "wqkv": dense(next(keys), dz, 3 * dz), "bqkv": jnp.zeros((3 * dz,), jnp.float32),
            "wo": dense(next(keys), dz, dz), "bo": jnp.zeros((dz,), jnp.float32),
            "ln2_g": jnp.ones((dz,), jnp.float32), "ln2_b": jnp.zeros((dz,), jnp.float32),
            "w1": dense(next(keys), dz, dff), "b1": jnp.zeros((dff,), jnp.float32),
            "w2": dense(next(keys), dff, dz), "b2": jnp.zeros((dz,), jnp.float32),
        }
        params["layers"].append(layer)
    return params


if __name__ == "__main__":
    m, nc, nt = 2, 8, 8
    dx, dy, dz = 2, 1, 32
    cfg = {"num_heads": 4, "num_layers": 2, "dff": 64}

    key = jax.random.PRNGKey(0)
    kp, kxc, kyc, kxt = jax.random.split(key, 4)
    params = init_params(kp, dx, dy, dz, cfg["num_heads"], cfg["num_layers"], cfg["dff"])

    xc = jax.random.normal(kxc, (m, nc, dx), jnp.float32)
    yc = jax.random.normal(kyc, (m, nc, dy), jnp.float32)
    xt = jax.random.normal(kxt, (m, nt, dx), jnp.float32)

    out = tnp_encoder_masked_forward(params, cfg, xc, yc, xt)
    out = jax.block_until_ready(out)
    assert out.shape == (m, nc + nt, dz), out.shape
    assert bool(jnp.all(jnp.isfinite(out)))
    print("KERNEL_OK")
</pallas_src>

<mosaic_0001>
module attributes {stable_mosaic.version = 11 : i64} {
  func.func @_tnp_fused_kernel(%arg0: i32, %arg1: i32, %arg2: memref<1x16x4xf32, #tpu.memory_space<vmem>>, %arg3: memref<4x32xf32, #tpu.memory_space<vmem>>, %arg4: memref<1x32xf32, #tpu.memory_space<vmem>>, %arg5: memref<32x32xf32, #tpu.memory_space<vmem>>, %arg6: memref<1x32xf32, #tpu.memory_space<vmem>>, %arg7: memref<1x1x32xf32, #tpu.memory_space<vmem>>, %arg8: memref<1x1x32xf32, #tpu.memory_space<vmem>>, %arg9: memref<1x32x96xf32, #tpu.memory_space<vmem>>, %arg10: memref<1x1x96xf32, #tpu.memory_space<vmem>>, %arg11: memref<1x32x32xf32, #tpu.memory_space<vmem>>, %arg12: memref<1x1x32xf32, #tpu.memory_space<vmem>>, %arg13: memref<1x1x32xf32, #tpu.memory_space<vmem>>, %arg14: memref<1x1x32xf32, #tpu.memory_space<vmem>>, %arg15: memref<1x32x64xf32, #tpu.memory_space<vmem>>, %arg16: memref<1x1x64xf32, #tpu.memory_space<vmem>>, %arg17: memref<1x64x32xf32, #tpu.memory_space<vmem>>, %arg18: memref<1x1x32xf32, #tpu.memory_space<vmem>>, %arg19: memref<1x16x32xf32, #tpu.memory_space<vmem>>) attributes {dimension_semantics = [#tpu.dimension_semantics<parallel>, #tpu.dimension_semantics<arbitrary>], iteration_bounds = array<i64: 2, 2>, scalar_prefetch = 0 : i64, scratch_operands = 0 : i64, tpu.core_type = #tpu.core_type<tc>, window_params = [{transform_indices = @transform_0, window_bounds = array<i64: 1, 16, 4>}, {pipeline_mode = #tpu.pipeline_mode<synchronous>, transform_indices = @transform_1, window_bounds = array<i64: 4, 32>}, {pipeline_mode = #tpu.pipeline_mode<synchronous>, transform_indices = @transform_2, window_bounds = array<i64: 1, 32>}, {pipeline_mode = #tpu.pipeline_mode<synchronous>, transform_indices = @transform_3, window_bounds = array<i64: 32, 32>}, {pipeline_mode = #tpu.pipeline_mode<synchronous>, transform_indices = @transform_4, window_bounds = array<i64: 1, 32>}, {transform_indices = @transform_5, window_bounds = array<i64: 1, 1, 32>}, {transform_indices = @transform_6, window_bounds = array<i64: 1, 1, 32>}, {transform_indices = @transform_7, window_bounds = array<i64: 1, 32, 96>}, {transform_indices = @transform_8, window_bounds = array<i64: 1, 1, 96>}, {transform_indices = @transform_9, window_bounds = array<i64: 1, 32, 32>}, {transform_indices = @transform_10, window_bounds = array<i64: 1, 1, 32>}, {transform_indices = @transform_11, window_bounds = array<i64: 1, 1, 32>}, {transform_indices = @transform_12, window_bounds = array<i64: 1, 1, 32>}, {transform_indices = @transform_13, window_bounds = array<i64: 1, 32, 64>}, {transform_indices = @transform_14, window_bounds = array<i64: 1, 1, 64>}, {transform_indices = @transform_15, window_bounds = array<i64: 1, 64, 32>}, {transform_indices = @transform_16, window_bounds = array<i64: 1, 1, 32>}, {transform_indices = @transform_17, window_bounds = array<i64: 1, 16, 32>}]} {
    %c0_i32 = arith.constant 0 : i32
    %0 = arith.cmpi eq, %arg1, %c0_i32 : i32
    %1 = arith.extui %0 : i1 to i32
    %c0_i32_0 = arith.constant 0 : i32
    %2 = arith.cmpi ne, %1, %c0_i32_0 : i32
    scf.if %2 {
      %c0_78 = arith.constant 0 : index
      %c0_79 = arith.constant 0 : index
      %c0_80 = arith.constant 0 : index
      %198 = vector.load %arg2[%c0_78, %c0_79, %c0_80] : memref<1x16x4xf32, #tpu.memory_space<vmem>>, vector<1x16x4xf32>
      %199 = vector.shape_cast %198 : vector<1x16x4xf32> to vector<16x4xf32>
      %c0_81 = arith.constant 0 : index
      %c0_82 = arith.constant 0 : index
      %200 = vector.load %arg3[%c0_81, %c0_82] : memref<4x32xf32, #tpu.memory_space<vmem>>, vector<4x32xf32>
      %201 = arith.truncf %199 : vector<16x4xf32> to vector<16x4xbf16>
      %202 = arith.truncf %200 : vector<4x32xf32> to vector<4x32xbf16>
      %cst_83 = arith.constant dense<0.000000e+00> : vector<16x32xf32>
      %203 = tpu.matmul %201, %202, %cst_83 {dimension_numbers = #tpu.dot_dimension_numbers<[1], [0], [0], [1], [0, 0, 1, 1], [], []>} : vector<16x4xbf16>, vector<4x32xbf16>, vector<16x32xf32> -> vector<16x32xf32>
      %c0_84 = arith.constant 0 : index
      %c0_85 = arith.constant 0 : index
      %204 = vector.load %arg4[%c0_84, %c0_85] : memref<1x32xf32, #tpu.memory_space<vmem>>, vector<1x32xf32>
      %205 = vector.broadcast %204 : vector<1x32xf32> to vector<16x32xf32>
      %206 = arith.addf %203, %205 : vector<16x32xf32>
      %cst_86 = arith.constant 0.000000e+00 : f32
      %207 = vector.broadcast %cst_86 : f32 to vector<16x32xf32>
      %208 = arith.maximumf %206, %207 : vector<16x32xf32>
      %c0_87 = arith.constant 0 : index
      %c0_88 = arith.constant 0 : index
      %209 = vector.load %arg5[%c0_87, %c0_88] : memref<32x32xf32, #tpu.memory_space<vmem>>, vector<32x32xf32>
      %210 = arith.truncf %208 : vector<16x32xf32> to vector<16x32xbf16>
      %211 = arith.truncf %209 : vector<32x32xf32> to vector<32x32xbf16>
      %cst_89 = arith.constant dense<0.000000e+00> : vector<16x32xf32>
      %212 = tpu.matmul %210, %211, %cst_89 {dimension_numbers = #tpu.dot_dimension_numbers<[1], [0], [0], [1], [0, 0, 1, 1], [], []>} : vector<16x32xbf16>, vector<32x32xbf16>, vector<16x32xf32> -> vector<16x32xf32>
      %c0_90 = arith.constant 0 : index
      %c0_91 = arith.constant 0 : index
      %213 = vector.load %arg6[%c0_90, %c0_91] : memref<1x32xf32, #tpu.memory_space<vmem>>, vector<1x32xf32>
      %214 = vector.broadcast %213 : vector<1x32xf32> to vector<16x32xf32>
      %215 = arith.addf %212, %214 : vector<16x32xf32>
      %c0_92 = arith.constant 0 : index
      %c0_93 = arith.constant 0 : index
      %c0_94 = arith.constant 0 : index
      %216 = vector.load %arg19[%c0_92, %c0_93, %c0_94] : memref<1x16x32xf32, #tpu.memory_space<vmem>>, vector<1x16x32xf32>
      %217 = vector.shape_cast %216 : vector<1x16x32xf32> to vector<16x32xf32>
      %218 = vector.shape_cast %215 : vector<16x32xf32> to vector<1x16x32xf32>
      tpu.vector_store %arg19[%c0_92, %c0_93, %c0_94], %218 {strides = array<i32>} : memref<1x16x32xf32, #tpu.memory_space<vmem>>, vector<1x16x32xf32>,
    } else {
    }
    %c0 = arith.constant 0 : index
    %c0_1 = arith.constant 0 : index
    %c0_2 = arith.constant 0 : index
    %3 = vector.load %arg19[%c0, %c0_1, %c0_2] : memref<1x16x32xf32, #tpu.memory_space<vmem>>, vector<1x16x32xf32>
    %4 = vector.shape_cast %3 : vector<1x16x32xf32> to vector<16x32xf32>
    %c0_3 = arith.constant 0 : index
    %c0_4 = arith.constant 0 : index
    %c0_5 = arith.constant 0 : index
    %5 = vector.load %arg7[%c0_3, %c0_4, %c0_5] : memref<1x1x32xf32, #tpu.memory_space<vmem>>, vector<1x1x32xf32>
    %6 = vector.shape_cast %5 : vector<1x1x32xf32> to vector<1x32xf32>
    %c0_6 = arith.constant 0 : index
    %c0_7 = arith.constant 0 : index
    %c0_8 = arith.constant 0 : index
    %7 = vector.load %arg8[%c0_6, %c0_7, %c0_8] : memref<1x1x32xf32, #tpu.memory_space<vmem>>, vector<1x1x32xf32>
    %8 = vector.shape_cast %7 : vector<1x1x32xf32> to vector<1x32xf32>
    %cst = arith.constant dense<0.000000e+00> : vector<16xf32>
    %9 = vector.multi_reduction <add>, %4, %cst [1] : vector<16x32xf32> to vector<16xf32>
    %10 = vector.shape_cast %9 : vector<16xf32> to vector<16x1xf32>
    %cst_9 = arith.constant 3.200000e+01 : f32
    %11 = vector.broadcast %cst_9 : f32 to vector<16x1xf32>
    %12 = arith.divf %10, %11 : vector<16x1xf32>
    %13 = vector.broadcast %12 : vector<16x1xf32> to vector<16x32xf32>
    %14 = arith.subf %4, %13 : vector<16x32xf32>
    %15 = arith.mulf %14, %14 : vector<16x32xf32>
    %cst_10 = arith.constant dense<0.000000e+00> : vector<16xf32>
    %16 = vector.multi_reduction <add>, %15, %cst_10 [1] : vector<16x32xf32> to vector<16xf32>
    %17 = vector.shape_cast %16 : vector<16xf32> to vector<16x1xf32>
    %cst_11 = arith.constant 3.200000e+01 : f32
    %18 = vector.broadcast %cst_11 : f32 to vector<16x1xf32>
    %19 = arith.divf %17, %18 : vector<16x1xf32>
    %cst_12 = arith.constant 9.99999974E-6 : f32
    %20 = vector.broadcast %cst_12 : f32 to vector<16x1xf32>
    %21 = arith.addf %19, %20 : vector<16x1xf32>
    %22 = math.rsqrt %21 : vector<16x1xf32>
    %23 = vector.broadcast %22 : vector<16x1xf32> to vector<16x32xf32>
    %24 = arith.mulf %14, %23 : vector<16x32xf32>
    %25 = vector.broadcast %6 : vector<1x32xf32> to vector<16x32xf32>
    %26 = arith.mulf %24, %25 : vector<16x32xf32>
    %27 = vector.broadcast %8 : vector<1x32xf32> to vector<16x32xf32>
    %28 = arith.addf %26, %27 : vector<16x32xf32>
    %c0_13 = arith.constant 0 : index
    %c0_14 = arith.constant 0 : index
    %c0_15 = arith.constant 0 : index
    %29 = vector.load %arg9[%c0_13, %c0_14, %c0_15] : memref<1x32x96xf32, #tpu.memory_space<vmem>>, vector<1x32x96xf32>
    %30 = vector.shape_cast %29 : vector<1x32x96xf32> to vector<32x96xf32>
    %31 = arith.truncf %28 : vector<16x32xf32> to vector<16x32xbf16>
    %32 = arith.truncf %30 : vector<32x96xf32> to vector<32x96xbf16>
    %cst_16 = arith.constant dense<0.000000e+00> : vector<16x96xf32>
    %33 = tpu.matmul %31, %32, %cst_16 {dimension_numbers = #tpu.dot_dimension_numbers<[1], [0], [0], [1], [0, 0, 1, 1], [], []>} : vector<16x32xbf16>, vector<32x96xbf16>, vector<16x96xf32> -> vector<16x96xf32>
    %c0_17 = arith.constant 0 : index
    %c0_18 = arith.constant 0 : index
    %c0_19 = arith.constant 0 : index
    %34 = vector.load %arg10[%c0_17, %c0_18, %c0_19] : memref<1x1x96xf32, #tpu.memory_space<vmem>>, vector<1x1x96xf32>
    %35 = vector.shape_cast %34 : vector<1x1x96xf32> to vector<1x96xf32>
    %36 = vector.broadcast %35 : vector<1x96xf32> to vector<16x96xf32>
    %37 = arith.addf %33, %36 : vector<16x96xf32>
    %38 = vector.extract_strided_slice %37 {offsets = [0, 0], sizes = [16, 32], strides = [1, 1]} : vector<16x96xf32> to vector<16x32xf32>
    %39 = vector.extract_strided_slice %37 {offsets = [0, 32], sizes = [16, 32], strides = [1, 1]} : vector<16x96xf32> to vector<16x32xf32>
    %40 = vector.extract_strided_slice %37 {offsets = [0, 64], sizes = [16, 32], strides = [1, 1]} : vector<16x96xf32> to vector<16x32xf32>
    %41 = tpu.iota {dimensions = array<i32: 0>} : vector<16x16xi32>
    %42 = tpu.iota {dimensions = array<i32: 1>} : vector<16x16xi32>
    %c8_i32 = arith.constant 8 : i32
    %43 = vector.broadcast %c8_i32 : i32 to vector<16x16xi32>
    %44 = arith.cmpi slt, %41, %43 : vector<16x16xi32>
    %c8_i32_20 = arith.constant 8 : i32
    %45 = vector.broadcast %c8_i32_20 : i32 to vector<16x16xi32>
    %46 = arith.cmpi slt, %42, %45 : vector<16x16xi32>
    %47 = arith.andi %44, %46 : vector<16x16xi1>
    %48 = arith.cmpi sle, %42, %41 : vector<16x16xi32>
    %49 = arith.andi %47, %48 : vector<16x16xi1>
    %cst_21 = arith.constant dense<true> : vector<16x16xi1>
    %50 = arith.xori %44, %cst_21 : vector<16x16xi1>
    %51 = arith.cmpi eq, %42, %41 : vector<16x16xi32>
    %52 = arith.ori %46, %51 : vector<16x16xi1>
    %53 = arith.andi %50, %52 : vector<16x16xi1>
    %54 = arith.ori %49, %53 : vector<16x16xi1>
    %55 = vector.extract_strided_slice %38 {offsets = [0, 0], sizes = [16, 8], strides = [1, 1]} : vector<16x32xf32> to vector<16x8xf32>
    %56 = arith.truncf %55 : vector<16x8xf32> to vector<16x8xbf16>
    %57 = vector.extract_strided_slice %39 {offsets = [0, 0], sizes = [16, 8], strides = [1, 1]} : vector<16x32xf32> to vector<16x8xf32>
    %58 = arith.truncf %57 : vector<16x8xf32> to vector<16x8xbf16>
    %cst_22 = arith.constant dense<0.000000e+00> : vector<16x16xf32>
    %59 = tpu.matmul %56, %58, %cst_22 {dimension_numbers = #tpu.dot_dimension_numbers<[1], [1], [0], [0], [0, 0, 1, 0], [], []>} : vector<16x8xbf16>, vector<16x8xbf16>, vector<16x16xf32> -> vector<16x16xf32>
    %cst_23 = arith.constant -1.000000e+09 : f32
    %60 = vector.broadcast %cst_23 : f32 to vector<16x16xf32>
    %61 = arith.select %54, %59, %60 : vector<16x16xi1>, vector<16x16xf32>
    %cst_24 = arith.constant dense<0xFF800000> : vector<16xf32>
    %62 = vector.multi_reduction <maximumf>, %61, %cst_24 [1] : vector<16x16xf32> to vector<16xf32>
    %63 = vector.shape_cast %62 : vector<16xf32> to vector<16x1xf32>
    %64 = vector.broadcast %63 : vector<16x1xf32> to vector<16x16xf32>
    %65 = arith.subf %61, %64 : vector<16x16xf32>
    %66 = math.exp %65 : vector<16x16xf32>
    %cst_25 = arith.constant dense<0.000000e+00> : vector<16xf32>
    %67 = vector.multi_reduction <add>, %66, %cst_25 [1] : vector<16x16xf32> to vector<16xf32>
    %68 = vector.shape_cast %67 : vector<16xf32> to vector<16x1xf32>
    %69 = tpu.reciprocal %68 {approx = true} : vector<16x1xf32> -> vector<16x1xf32>
    %70 = vector.broadcast %69 : vector<16x1xf32> to vector<16x16xf32>
    %71 = arith.mulf %66, %70 : vector<16x16xf32>
    %72 = vector.extract_strided_slice %40 {offsets = [0, 0], sizes = [16, 8], strides = [1, 1]} : vector<16x32xf32> to vector<16x8xf32>
    %73 = arith.truncf %71 : vector<16x16xf32> to vector<16x16xbf16>
    %74 = arith.truncf %72 : vector<16x8xf32> to vector<16x8xbf16>
    %cst_26 = arith.constant dense<0.000000e+00> : vector<16x8xf32>
    %75 = tpu.matmul %73, %74, %cst_26 {dimension_numbers = #tpu.dot_dimension_numbers<[1], [0], [0], [1], [0, 0, 1, 1], [], []>} : vector<16x16xbf16>, vector<16x8xbf16>, vector<16x8xf32> -> vector<16x8xf32>
    %76 = vector.extract_strided_slice %38 {offsets = [0, 8], sizes = [16, 8], strides = [1, 1]} : vector<16x32xf32> to vector<16x8xf32>
    %77 = arith.truncf %76 : vector<16x8xf32> to vector<16x8xbf16>
    %78 = vector.extract_strided_slice %39 {offsets = [0, 8], sizes = [16, 8], strides = [1, 1]} : vector<16x32xf32> to vector<16x8xf32>
    %79 = arith.truncf %78 : vector<16x8xf32> to vector<16x8xbf16>
    %cst_27 = arith.constant dense<0.000000e+00> : vector<16x16xf32>
    %80 = tpu.matmul %77, %79, %cst_27 {dimension_numbers = #tpu.dot_dimension_numbers<[1], [1], [0], [0], [0, 0, 1, 0], [], []>} : vector<16x8xbf16>, vector<16x8xbf16>, vector<16x16xf32> -> vector<16x16xf32>
    %cst_28 = arith.constant -1.000000e+09 : f32
    %81 = vector.broadcast %cst_28 : f32 to vector<16x16xf32>
    %82 = arith.select %54, %80, %81 : vector<16x16xi1>, vector<16x16xf32>
    %cst_29 = arith.constant dense<0xFF800000> : vector<16xf32>
    %83 = vector.multi_reduction <maximumf>, %82, %cst_29 [1] : vector<16x16xf32> to vector<16xf32>
    %84 = vector.shape_cast %83 : vector<16xf32> to vector<16x1xf32>
    %85 = vector.broadcast %84 : vector<16x1xf32> to vector<16x16xf32>
    %86 = arith.subf %82, %85 : vector<16x16xf32>
    %87 = math.exp %86 : vector<16x16xf32>
    %cst_30 = arith.constant dense<0.000000e+00> : vector<16xf32>
    %88 = vector.multi_reduction <add>, %87, %cst_30 [1] : vector<16x16xf32> to vector<16xf32>
    %89 = vector.shape_cast %88 : vector<16xf32> to vector<16x1xf32>
    %90 = tpu.reciprocal %89 {approx = true} : vector<16x1xf32> -> vector<16x1xf32>
    %91 = vector.broadcast %90 : vector<16x1xf32> to vector<16x16xf32>
    %92 = arith.mulf %87, %91 : vector<16x16xf32>
    %93 = vector.extract_strided_slice %40 {offsets = [0, 8], sizes = [16, 8], strides = [1, 1]} : vector<16x32xf32> to vector<16x8xf32>
    %94 = arith.truncf %92 : vector<16x16xf32> to vector<16x16xbf16>
    %95 = arith.truncf %93 : vector<16x8xf32> to vector<16x8xbf16>
    %cst_31 = arith.constant dense<0.000000e+00> : vector<16x8xf32>
    %96 = tpu.matmul %94, %95, %cst_31 {dimension_numbers = #tpu.dot_dimension_numbers<[1], [0], [0], [1], [0, 0, 1, 1], [], []>} : vector<16x16xbf16>, vector<16x8xbf16>, vector<16x8xf32> -> vector<16x8xf32>
    %97 = vector.extract_strided_slice %38 {offsets = [0, 16], sizes = [16, 8], strides = [1, 1]} : vector<16x32xf32> to vector<16x8xf32>
    %98 = arith.truncf %97 : vector<16x8xf32> to vector<16x8xbf16>
    %99 = vector.extract_strided_slice %39 {offsets = [0, 16], sizes = [16, 8], strides = [1, 1]} : vector<16x32xf32> to vector<16x8xf32>
    %100 = arith.truncf %99 : vector<16x8xf32> to vector<16x8xbf16>
    %cst_32 = arith.constant dense<0.000000e+00> : vector<16x16xf32>
    %101 = tpu.matmul %98, %100, %cst_32 {dimension_numbers = #tpu.dot_dimension_numbers<[1], [1], [0], [0], [0, 0, 1, 0], [], []>} : vector<16x8xbf16>, vector<16x8xbf16>, vector<16x16xf32> -> vector<16x16xf32>
    %cst_33 = arith.constant -1.000000e+09 : f32
    %102 = vector.broadcast %cst_33 : f32 to vector<16x16xf32>
    %103 = arith.select %54, %101, %102 : vector<16x16xi1>, vector<16x16xf32>
    %cst_34 = arith.constant dense<0xFF800000> : vector<16xf32>
    %104 = vector.multi_reduction <maximumf>, %103, %cst_34 [1] : vector<16x16xf32> to vector<16xf32>
    %105 = vector.shape_cast %104 : vector<16xf32> to vector<16x1xf32>
    %106 = vector.broadcast %105 : vector<16x1xf32> to vector<16x16xf32>
    %107 = arith.subf %103, %106 : vector<16x16xf32>
    %108 = math.exp %107 : vector<16x16xf32>
    %cst_35 = arith.constant dense<0.000000e+00> : vector<16xf32>
    %109 = vector.multi_reduction <add>, %108, %cst_35 [1] : vector<16x16xf32> to vector<16xf32>
    %110 = vector.shape_cast %109 : vector<16xf32> to vector<16x1xf32>
    %111 = tpu.reciprocal %110 {approx = true} : vector<16x1xf32> -> vector<16x1xf32>
    %112 = vector.broadcast %111 : vector<16x1xf32> to vector<16x16xf32>
    %113 = arith.mulf %108, %112 : vector<16x16xf32>
    %114 = vector.extract_strided_slice %40 {offsets = [0, 16], sizes = [16, 8], strides = [1, 1]} : vector<16x32xf32> to vector<16x8xf32>
    %115 = arith.truncf %113 : vector<16x16xf32> to vector<16x16xbf16>
    %116 = arith.truncf %114 : vector<16x8xf32> to vector<16x8xbf16>
    %cst_36 = arith.constant dense<0.000000e+00> : vector<16x8xf32>
    %117 = tpu.matmul %115, %116, %cst_36 {dimension_numbers = #tpu.dot_dimension_numbers<[1], [0], [0], [1], [0, 0, 1, 1], [], []>} : vector<16x16xbf16>, vector<16x8xbf16>, vector<16x8xf32> -> vector<16x8xf32>
    %118 = vector.extract_strided_slice %38 {offsets = [0, 24], sizes = [16, 8], strides = [1, 1]} : vector<16x32xf32> to vector<16x8xf32>
    %119 = arith.truncf %118 : vector<16x8xf32> to vector<16x8xbf16>
    %120 = vector.extract_strided_slice %39 {offsets = [0, 24], sizes = [16, 8], strides = [1, 1]} : vector<16x32xf32> to vector<16x8xf32>
    %121 = arith.truncf %120 : vector<16x8xf32> to vector<16x8xbf16>
    %cst_37 = arith.constant dense<0.000000e+00> : vector<16x16xf32>
    %122 = tpu.matmul %119, %121, %cst_37 {dimension_numbers = #tpu.dot_dimension_numbers<[1], [1], [0], [0], [0, 0, 1, 0], [], []>} : vector<16x8xbf16>, vector<16x8xbf16>, vector<16x16xf32> -> vector<16x16xf32>
    %cst_38 = arith.constant -1.000000e+09 : f32
    %123 = vector.broadcast %cst_38 : f32 to vector<16x16xf32>
    %124 = arith.select %54, %122, %123 : vector<16x16xi1>, vector<16x16xf32>
    %cst_39 = arith.constant dense<0xFF800000> : vector<16xf32>
    %125 = vector.multi_reduction <maximumf>, %124, %cst_39 [1] : vector<16x16xf32> to vector<16xf32>
    %126 = vector.shape_cast %125 : vector<16xf32> to vector<16x1xf32>
    %127 = vector.broadcast %126 : vector<16x1xf32> to vector<16x16xf32>
    %128 = arith.subf %124, %127 : vector<16x16xf32>
    %129 = math.exp %128 : vector<16x16xf32>
    %cst_40 = arith.constant dense<0.000000e+00> : vector<16xf32>
    %130 = vector.multi_reduction <add>, %129, %cst_40 [1] : vector<16x16xf32> to vector<16xf32>
    %131 = vector.shape_cast %130 : vector<16xf32> to vector<16x1xf32>
    %132 = tpu.reciprocal %131 {approx = true} : vector<16x1xf32> -> vector<16x1xf32>
    %133 = vector.broadcast %132 : vector<16x1xf32> to vector<16x16xf32>
    %134 = arith.mulf %129, %133 : vector<16x16xf32>
    %135 = vector.extract_strided_slice %40 {offsets = [0, 24], sizes = [16, 8], strides = [1, 1]} : vector<16x32xf32> to vector<16x8xf32>
    %136 = arith.truncf %134 : vector<16x16xf32> to vector<16x16xbf16>
    %137 = arith.truncf %135 : vector<16x8xf32> to vector<16x8xbf16>
    %cst_41 = arith.constant dense<0.000000e+00> : vector<16x8xf32>
    %138 = tpu.matmul %136, %137, %cst_41 {dimension_numbers = #tpu.dot_dimension_numbers<[1], [0], [0], [1], [0, 0, 1, 1], [], []>} : vector<16x16xbf16>, vector<16x8xbf16>, vector<16x8xf32> -> vector<16x8xf32>
    %139 = tpu.concatenate %75, %96, %117, %138 in 1 : vector<16x8xf32>, vector<16x8xf32>, vector<16x8xf32>, vector<16x8xf32> -> vector<16x32xf32>
    %c0_42 = arith.constant 0 : index
    %c0_43 = arith.constant 0 : index
    %c0_44 = arith.constant 0 : index
    %140 = vector.load %arg11[%c0_42, %c0_43, %c0_44] : memref<1x32x32xf32, #tpu.memory_space<vmem>>, vector<1x32x32xf32>
    %141 = vector.shape_cast %140 : vector<1x32x32xf32> to vector<32x32xf32>
    %142 = arith.truncf %139 : vector<16x32xf32> to vector<16x32xbf16>
    %143 = arith.truncf %141 : vector<32x32xf32> to vector<32x32xbf16>
    %cst_45 = arith.constant dense<0.000000e+00> : vector<16x32xf32>
    %144 = tpu.matmul %142, %143, %cst_45 {dimension_numbers = #tpu.dot_dimension_numbers<[1], [0], [0], [1], [0, 0, 1, 1], [], []>} : vector<16x32xbf16>, vector<32x32xbf16>, vector<16x32xf32> -> vector<16x32xf32>
    %145 = arith.addf %4, %144 : vector<16x32xf32>
    %c0_46 = arith.constant 0 : index
    %c0_47 = arith.constant 0 : index
    %c0_48 = arith.constant 0 : index
    %146 = vector.load %arg12[%c0_46, %c0_47, %c0_48] : memref<1x1x32xf32, #tpu.memory_space<vmem>>, vector<1x1x32xf32>
    %147 = vector.shape_cast %146 : vector<1x1x32xf32> to vector<1x32xf32>
    %148 = vector.broadcast %147 : vector<1x32xf32> to vector<16x32xf32>
    %149 = arith.addf %145, %148 : vector<16x32xf32>
    %c0_49 = arith.constant 0 : index
    %c0_50 = arith.constant 0 : index
    %c0_51 = arith.constant 0 : index
    %150 = vector.load %arg13[%c0_49, %c0_50, %c0_51] : memref<1x1x32xf32, #tpu.memory_space<vmem>>, vector<1x1x32xf32>
    %151 = vector.shape_cast %150 : vector<1x1x32xf32> to vector<1x32xf32>
    %c0_52 = arith.constant 0 : index
    %c0_53 = arith.constant 0 : index
    %c0_54 = arith.constant 0 : index
    %152 = vector.load %arg14[%c0_52, %c0_53, %c0_54] : memref<1x1x32xf32, #tpu.memory_space<vmem>>, vector<1x1x32xf32>
    %153 = vector.shape_cast %152 : vector<1x1x32xf32> to vector<1x32xf32>
    %cst_55 = arith.constant dense<0.000000e+00> : vector<16xf32>
    %154 = vector.multi_reduction <add>, %149, %cst_55 [1] : vector<16x32xf32> to vector<16xf32>
    %155 = vector.shape_cast %154 : vector<16xf32> to vector<16x1xf32>
    %cst_56 = arith.constant 3.200000e+01 : f32
    %156 = vector.broadcast %cst_56 : f32 to vector<16x1xf32>
    %157 = arith.divf %155, %156 : vector<16x1xf32>
    %158 = vector.broadcast %157 : vector<16x1xf32> to vector<16x32xf32>
    %159 = arith.subf %149, %158 : vector<16x32xf32>
    %160 = arith.mulf %159, %159 : vector<16x32xf32>
    %cst_57 = arith.constant dense<0.000000e+00> : vector<16xf32>
    %161 = vector.multi_reduction <add>, %160, %cst_57 [1] : vector<16x32xf32> to vector<16xf32>
    %162 = vector.shape_cast %161 : vector<16xf32> to vector<16x1xf32>
    %cst_58 = arith.constant 3.200000e+01 : f32
    %163 = vector.broadcast %cst_58 : f32 to vector<16x1xf32>
    %164 = arith.divf %162, %163 : vector<16x1xf32>
    %cst_59 = arith.constant 9.99999974E-6 : f32
    %165 = vector.broadcast %cst_59 : f32 to vector<16x1xf32>
    %166 = arith.addf %164, %165 : vector<16x1xf32>
    %167 = math.rsqrt %166 : vector<16x1xf32>
    %168 = vector.broadcast %167 : vector<16x1xf32> to vector<16x32xf32>
    %169 = arith.mulf %159, %168 : vector<16x32xf32>
    %170 = vector.broadcast %151 : vector<1x32xf32> to vector<16x32xf32>
    %171 = arith.mulf %169, %170 : vector<16x32xf32>
    %172 = vector.broadcast %153 : vector<1x32xf32> to vector<16x32xf32>
    %173 = arith.addf %171, %172 : vector<16x32xf32>
    %c0_60 = arith.constant 0 : index
    %c0_61 = arith.constant 0 : index
    %c0_62 = arith.constant 0 : index
    %174 = vector.load %arg15[%c0_60, %c0_61, %c0_62] : memref<1x32x64xf32, #tpu.memory_space<vmem>>, vector<1x32x64xf32>
    %175 = vector.shape_cast %174 : vector<1x32x64xf32> to vector<32x64xf32>
    %176 = arith.truncf %173 : vector<16x32xf32> to vector<16x32xbf16>
    %177 = arith.truncf %175 : vector<32x64xf32> to vector<32x64xbf16>
    %cst_63 = arith.constant dense<0.000000e+00> : vector<16x64xf32>
    %178 = tpu.matmul %176, %177, %cst_63 {dimension_numbers = #tpu.dot_dimension_numbers<[1], [0], [0], [1], [0, 0, 1, 1], [], []>} : vector<16x32xbf16>, vector<32x64xbf16>, vector<16x64xf32> -> vector<16x64xf32>
    %c0_64 = arith.constant 0 : index
    %c0_65 = arith.constant 0 : index
    %c0_66 = arith.constant 0 : index
    %179 = vector.load %arg16[%c0_64, %c0_65, %c0_66] : memref<1x1x64xf32, #tpu.memory_space<vmem>>, vector<1x1x64xf32>
    %180 = vector.shape_cast %179 : vector<1x1x64xf32> to vector<1x64xf32>
    %181 = vector.broadcast %180 : vector<1x64xf32> to vector<16x64xf32>
    %182 = arith.addf %178, %181 : vector<16x64xf32>
    %cst_67 = arith.constant 0.000000e+00 : f32
    %183 = vector.broadcast %cst_67 : f32 to vector<16x64xf32>
    %184 = arith.maximumf %182, %183 : vector<16x64xf32>
    %c0_68 = arith.constant 0 : index
    %c0_69 = arith.constant 0 : index
    %c0_70 = arith.constant 0 : index
    %185 = vector.load %arg17[%c0_68, %c0_69, %c0_70] : memref<1x64x32xf32, #tpu.memory_space<vmem>>, vector<1x64x32xf32>
    %186 = vector.shape_cast %185 : vector<1x64x32xf32> to vector<64x32xf32>
    %187 = arith.truncf %184 : vector<16x64xf32> to vector<16x64xbf16>
    %188 = arith.truncf %186 : vector<64x32xf32> to vector<64x32xbf16>
    %cst_71 = arith.constant dense<0.000000e+00> : vector<16x32xf32>
    %189 = tpu.matmul %187, %188, %cst_71 {dimension_numbers = #tpu.dot_dimension_numbers<[1], [0], [0], [1], [0, 0, 1, 1], [], []>} : vector<16x64xbf16>, vector<64x32xbf16>, vector<16x32xf32> -> vector<16x32xf32>
    %190 = arith.addf %149, %189 : vector<16x32xf32>
    %c0_72 = arith.constant 0 : index
    %c0_73 = arith.constant 0 : index
    %c0_74 = arith.constant 0 : index
    %191 = vector.load %arg18[%c0_72, %c0_73, %c0_74] : memref<1x1x32xf32, #tpu.memory_space<vmem>>, vector<1x1x32xf32>
    %192 = vector.shape_cast %191 : vector<1x1x32xf32> to vector<1x32xf32>
    %193 = vector.broadcast %192 : vector<1x32xf32> to vector<16x32xf32>
    %194 = arith.addf %190, %193 : vector<16x32xf32>
    %c0_75 = arith.constant 0 : index
    %c0_76 = arith.constant 0 : index
    %c0_77 = arith.constant 0 : index
    %195 = vector.load %arg19[%c0_75, %c0_76, %c0_77] : memref<1x16x32xf32, #tpu.memory_space<vmem>>, vector<1x16x32xf32>
    %196 = vector.shape_cast %195 : vector<1x16x32xf32> to vector<16x32xf32>
    %197 = vector.shape_cast %194 : vector<16x32xf32> to vector<1x16x32xf32>
    tpu.vector_store %arg19[%c0_75, %c0_76, %c0_77], %197 {strides = array<i32>} : memref<1x16x32xf32, #tpu.memory_space<vmem>>, vector<1x16x32xf32>,
    return
  }
  func.func @transform_0(%arg0: i32, %arg1: i32) -> (i32, i32, i32) {
    %c0_i32 = arith.constant 0 : i32
    %c0_i32_0 = arith.constant 0 : i32
    %c0_i32_1 = arith.constant 0 : i32
    return %arg0, %c0_i32, %c0_i32_0 : i32, i32, i32
  }
  func.func @transform_1(%arg0: i32, %arg1: i32) -> (i32, i32) {
    %c0_i32 = arith.constant 0 : i32
    %c0_i32_0 = arith.constant 0 : i32
    %c0_i32_1 = arith.constant 0 : i32
    return %c0_i32, %c0_i32_0 : i32, i32
  }
  func.func @transform_2(%arg0: i32, %arg1: i32) -> (i32, i32) {
    %c0_i32 = arith.constant 0 : i32
    %c0_i32_0 = arith.constant 0 : i32
    %c0_i32_1 = arith.constant 0 : i32
    return %c0_i32, %c0_i32_0 : i32, i32
  }
  func.func @transform_3(%arg0: i32, %arg1: i32) -> (i32, i32) {
    %c0_i32 = arith.constant 0 : i32
    %c0_i32_0 = arith.constant 0 : i32
    %c0_i32_1 = arith.constant 0 : i32
    return %c0_i32, %c0_i32_0 : i32, i32
  }
  func.func @transform_4(%arg0: i32, %arg1: i32) -> (i32, i32) {
    %c0_i32 = arith.constant 0 : i32
    %c0_i32_0 = arith.constant 0 : i32
    %c0_i32_1 = arith.constant 0 : i32
    return %c0_i32, %c0_i32_0 : i32, i32
  }
  func.func @transform_5(%arg0: i32, %arg1: i32) -> (i32, i32, i32) {
    %c0_i32 = arith.constant 0 : i32
    %c0_i32_0 = arith.constant 0 : i32
    %c0_i32_1 = arith.constant 0 : i32
    return %arg1, %c0_i32, %c0_i32_0 : i32, i32, i32
  }
  func.func @transform_6(%arg0: i32, %arg1: i32) -> (i32, i32, i32) {
    %c0_i32 = arith.constant 0 : i32
    %c0_i32_0 = arith.constant 0 : i32
    %c0_i32_1 = arith.constant 0 : i32
    return %arg1, %c0_i32, %c0_i32_0 : i32, i32, i32
  }
  func.func @transform_7(%arg0: i32, %arg1: i32) -> (i32, i32, i32) {
    %c0_i32 = arith.constant 0 : i32
    %c0_i32_0 = arith.constant 0 : i32
    %c0_i32_1 = arith.constant 0 : i32
    return %arg1, %c0_i32, %c0_i32_0 : i32, i32, i32
  }
  func.func @transform_8(%arg0: i32, %arg1: i32) -> (i32, i32, i32) {
    %c0_i32 = arith.constant 0 : i32
    %c0_i32_0 = arith.constant 0 : i32
    %c0_i32_1 = arith.constant 0 : i32
    return %arg1, %c0_i32, %c0_i32_0 : i32, i32, i32
  }
  func.func @transform_9(%arg0: i32, %arg1: i32) -> (i32, i32, i32) {
    %c0_i32 = arith.constant 0 : i32
    %c0_i32_0 = arith.constant 0 : i32
    %c0_i32_1 = arith.constant 0 : i32
    return %arg1, %c0_i32, %c0_i32_0 : i32, i32, i32
  }
  func.func @transform_10(%arg0: i32, %arg1: i32) -> (i32, i32, i32) {
    %c0_i32 = arith.constant 0 : i32
    %c0_i32_0 = arith.constant 0 : i32
    %c0_i32_1 = arith.constant 0 : i32
    return %arg1, %c0_i32, %c0_i32_0 : i32, i32, i32
  }
  func.func @transform_11(%arg0: i32, %arg1: i32) -> (i32, i32, i32) {
    %c0_i32 = arith.constant 0 : i32
    %c0_i32_0 = arith.constant 0 : i32
    %c0_i32_1 = arith.constant 0 : i32
    return %arg1, %c0_i32, %c0_i32_0 : i32, i32, i32
  }
  func.func @transform_12(%arg0: i32, %arg1: i32) -> (i32, i32, i32) {
    %c0_i32 = arith.constant 0 : i32
    %c0_i32_0 = arith.constant 0 : i32
    %c0_i32_1 = arith.constant 0 : i32
    return %arg1, %c0_i32, %c0_i32_0 : i32, i32, i32
  }
  func.func @transform_13(%arg0: i32, %arg1: i32) -> (i32, i32, i32) {
    %c0_i32 = arith.constant 0 : i32
    %c0_i32_0 = arith.constant 0 : i32
    %c0_i32_1 = arith.constant 0 : i32
    return %arg1, %c0_i32, %c0_i32_0 : i32, i32, i32
  }
  func.func @transform_14(%arg0: i32, %arg1: i32) -> (i32, i32, i32) {
    %c0_i32 = arith.constant 0 : i32
    %c0_i32_0 = arith.constant 0 : i32
    %c0_i32_1 = arith.constant 0 : i32
    return %arg1, %c0_i32, %c0_i32_0 : i32, i32, i32
  }
  func.func @transform_15(%arg0: i32, %arg1: i32) -> (i32, i32, i32) {
    %c0_i32 = arith.constant 0 : i32
    %c0_i32_0 = arith.constant 0 : i32
    %c0_i32_1 = arith.constant 0 : i32
    return %arg1, %c0_i32, %c0_i32_0 : i32, i32, i32
  }
  func.func @transform_16(%arg0: i32, %arg1: i32) -> (i32, i32, i32) {
    %c0_i32 = arith.constant 0 : i32
    %c0_i32_0 = arith.constant 0 : i32
    %c0_i32_1 = arith.constant 0 : i32
    return %arg1, %c0_i32, %c0_i32_0 : i32, i32, i32
  }
  func.func @transform_17(%arg0: i32, %arg1: i32) -> (i32, i32, i32) {
    %c0_i32 = arith.constant 0 : i32
    %c0_i32_0 = arith.constant 0 : i32
    %c0_i32_1 = arith.constant 0 : i32
    return %arg0, %c0_i32, %c0_i32_0 : i32, i32, i32
  }
}

</mosaic_0001>

<bundles_post_ra>
// kernel: tpu_custom_call.1
= control target key start
LH: loop header
LB: loop body
LE: loop exit
PB: predicated region body
PF: predicated region fallthrough
CT: control target
= control target key end

     0   :  { %s4003_s0 = inlined_call_operand.vmem [shape: f32[2,16,4], index: 0, kind: input, shape index: {}]   ;;  %s4004_s1 = inlined_call_operand.hbm [shape: f32[4,32], index: 1, kind: input, shape index: {}]   ;;  %s4005_s2 = inlined_call_operand.hbm [shape: f32[1,32], index: 2, kind: input, shape index: {}]   ;;  %s4006_s3 = inlined_call_operand.vmem [shape: f32[32,32], index: 3, kind: input, shape index: {}]   ;;  %s4007_s4 = inlined_call_operand.hbm [shape: f32[1,32], index: 4, kind: input, shape index: {}]   ;;  %s4008_s5 = inlined_call_operand.hbm [shape: f32[2,1,32], index: 5, kind: input, shape index: {}]   ;;  %s4009_s6 = inlined_call_operand.hbm [shape: f32[2,1,32], index: 6, kind: input, shape index: {}]   ;;  %s4010_s7 = inlined_call_operand.vmem [shape: f32[2,32,96], index: 7, kind: input, shape index: {}]   ;;  %s4011_s8 = inlined_call_operand.hbm [shape: f32[2,1,96], index: 8, kind: input, shape index: {}]   ;;  %s4012_s9 = inlined_call_operand.vmem [shape: f32[2,32,32], index: 9, kind: input, shape index: {}]   ;;  %s4013_s10 = inlined_call_operand.hbm [shape: f32[2,1,32], index: 10, kind: input, shape index: {}]   ;;  %s4014_s11 = inlined_call_operand.hbm [shape: f32[2,1,32], index: 11, kind: input, shape index: {}]   ;;  %s4015_s12 = inlined_call_operand.hbm [shape: f32[2,1,32], index: 12, kind: input, shape index: {}]   ;;  %s4016_s13 = inlined_call_operand.vmem [shape: f32[2,32,64], index: 13, kind: input, shape index: {}]   ;;  %s4017_s14 = inlined_call_operand.hbm [shape: f32[2,1,64], index: 14, kind: input, shape index: {}]   ;;  %s4018_s15 = inlined_call_operand.vmem [shape: f32[2,64,32], index: 15, kind: input, shape index: {}]   ;;  %s4019_s16 = inlined_call_operand.vmem [shape: f32[2,1,32], index: 16, kind: input, shape index: {}]   ;;  %s4020_s17 = inlined_call_operand.hbm [shape: f32[2,16,32], index: 17, kind: output, shape index: {}]  }
   0x1   :  { %4054 = sst [smem:[#allocation41_spill]] %s4003_s0 }
   0x2   :  { %4055 = sst [smem:[#allocation42_spill]] %s4004_s1 }
   0x3   :  { %4056 = sst [smem:[#allocation43_spill]] %s4005_s2 }
   0x4   :  { %4057 = sst [smem:[#allocation44_spill]] %s4006_s3 }
   0x5   :  { %4058 = sst [smem:[#allocation45_spill]] %s4007_s4 }
   0x6   :  { %4059 = sst [smem:[#allocation46_spill]] %s4008_s5 }
   0x7   :  { %4060 = sst [smem:[#allocation47_spill]] %s4009_s6 }
   0x8   :  { %4061 = sst [smem:[#allocation48_spill]] %s4010_s7 }
   0x9   :  { %4062 = sst [smem:[#allocation49_spill]] %s4011_s8 }
   0xa   :  { %4063 = sst [smem:[#allocation50_spill]] %s4012_s9 }
   0xb   :  { %4064 = sst [smem:[#allocation51_spill]] %s4013_s10 }
   0xc   :  { %4065 = sst [smem:[#allocation52_spill]] %s4014_s11 }
   0xd   :  { %4066 = sst [smem:[#allocation53_spill]] %s4016_s13 }
   0xe   :  { %4067 = sst [smem:[#allocation54_spill]] %s4018_s15 }
   0xf   :  { %4068 = sst [smem:[#allocation55_spill]] %s4019_s16 }
  0x10   :  { %4069 = sst [smem:[#allocation56_spill]] %s4020_s17 }
  0x11   :  { %22 = vsyncpa [#allocation3], 0 }
  0x12   :  { %23 = vsyncpa [#allocation6], 0 }
  0x13   :  { %24 = vsyncpa [#allocation9], 0 }
  0x14   :  { %26 = vsyncpa [#allocation9 + $0x1], 0 }
  0x15   :  { %27 = vsyncpa [#allocation12], 0 }
  0x16   :  { %29 = vsyncpa [#allocation12 + $0x1], 0 }
  0x17   :  { %30 = vsyncpa [#allocation15], 0 }
  0x18   :  { %32 = vsyncpa [#allocation15 + $0x1], 0 }
  0x19   :  { %33 = vsyncpa [#allocation18], 0 }
  0x1a   :  { %35 = vsyncpa [#allocation18 + $0x1], 0 }
  0x1b   :  { %36 = vsyncpa [#allocation4], 0 }
  0x1c   :  { %38 = vsyncpa [#allocation4 + $0x1], 0  ;;  %s3240_s24 = smov 0   ;;  %s3242_s25 = smov 0  }
  0x1d   :  { %s3244_s26 = smov 0   ;;  %s3246_s27 = smov 0  }
  0x1e   :  { %s3248_s28 = smov 0   ;;  %s3250_s29 = smov 0  }
  0x1f   :  { %s3252_s0 = smov 0   ;;  %s3254_s30 = smov 0  }
  0x20   :  { %s3256_s18 = smov 0   ;;  %s3258_s19 = smov 0  }
  0x21   :  { %s3260_s1 = smov 0  }
  0x22 LB: > { %4070 = sst [smem:[#allocation27_spill]] %s3078_s24  ;;  %s3294_s20 = sadd.s32 4294967295, %s3118_s1   ;;  %s3118_s1 = sphi %s3260_s1, %s44_s1   ;;  %s3114_s19 = sphi %s3258_s19, %s4165_s19   ;;  %s3110_s18 = sphi %s3256_s18, %s4164_s18   ;;  %s3106_s30 = sphi %s3254_s30, %s4163_s30   ;;  %s3102_s0 = sphi %s3252_s0, %s4162_s0   ;;  %s3098_s29 = sphi %s3250_s29, %s4169_s29   ;;  %s3094_s28 = sphi %s3248_s28, %s4168_s28   ;;  %s3090_s27 = sphi %s3246_s27, %s4160_s27   ;;  %s3086_s26 = sphi %s3244_s26, %s4167_s26   ;;  %s3082_s25 = sphi %s3242_s25, %s4166_s25   ;;  %s3078_s24 = sphi %s3240_s24, %s4159_s24  }
  0x23   : > { %4071 = sst [smem:[#allocation28_spill]] %s3082_s25  ;;  %s2248_s21 = sadd.s32 4294967294, %s3118_s1  }
  0x24   : > { %4072 = sst [smem:[#allocation29_spill]] %s3094_s28  ;;  %p180_p0 = scmp.ne.s32.totalorder %s3098_s29, %s3094_s28 }
  0x25   : > { %4073 = sst [smem:[#allocation30_spill]] %s3102_s0  ;;  %p181_p1 = scmp.eq.s32.totalorder %s3118_s1, 0 }
  0x26   : > { %4074 = sst [smem:[#allocation31_spill]] %s3106_s30  ;;  %p186_p2 = scmp.ne.s32.totalorder %s3094_s28, %s3090_s27 }
  0x27   : > { %4075 = sst [smem:[#allocation32_spill]] %s3110_s18  ;;  %p4029_p3 = scmp.eq.s32.totalorder %s3294_s20, 0 }
  0x28   : > { %4076 = sst [smem:[#allocation33_spill]] %s3114_s19  ;;  %p3304_p4 = por %p181_p1, %p180_p0 }
  0x29   : > { %4077 = sst [smem:[#allocation34_spill]] %s3118_s1  ;;  %p495_p5 = scmp.ne.s32.totalorder %s3086_s26, %s3082_s25 }
  0x2a   : > { %p3312_p6 = por %p4029_p3, %p186_p2  ;;  %p496_p7 = scmp.eq.s32.totalorder %s3294_s20, 3 }
  0x2b   : > { %p501_p8 = scmp.ne.s32.totalorder %s3082_s25, %s3078_s24  ;;  %p502_p9 = scmp.eq.s32.totalorder %s2248_s21, 3 }
  0x2c   : > { %s4079_s3 = scalar_select %p3312_p6, 1, 0 }
  0x2d   : > { %p3319_p10 = por %p496_p7, %p495_p5  ;;  %p2249_p11 = scmp.ge.s32.totalorder %s3118_s1, 1 }
  0x2e   : > { %4080 = sst [smem:[#allocation35_spill]] %s4079_s3  ;;  %p3324_p12 = por %p502_p9, %p501_p8 }
  0x2f   : > { %s4081_s27 = scalar_select %p3319_p10, 1, 0 }
  0x30   : > { %s4083_s23 = scalar_select %p3324_p12, 1, 0 }
  0x31   : > { %4082 = sst [smem:[#allocation36_spill]] %s4081_s27  ;;  %p509_p13 = scmp.lt.s32.totalorder %s3118_s1, 5 }
  0x32   : > { %4084 = sst [smem:[#allocation37_spill]] %s4083_s23  ;;  %s3120_s16 = smov [#allocation5]  }
  0x33   : > { %p3329_p0 = pnand %p2249_p11, %p509_p13  ;;  %s533_s15 = sshll.u32 %s3120_s16, 4  ;;  %s534_s15 = int_to_ptr.vmem [resolvable:$true] %s533_s15 }
  0x34   : > { %p2512_p2 = scmp.lt.s32.totalorder %s3118_s1, 4  ;;  %s4088_s2 = sld [smem:[#allocation43_spill]] }
  0x35   : > { %s4085_s22 = scalar_select %p3329_p0, 1, 0 }
  0x36   : > { %p2473_p1 = pneg %p3329_p0  ;;  %p3344_p7 = pnand %p2512_p2, %p3304_p4 }
  0x38   : > { %p3338_p5 = pnand %p2473_p1, %p4029_p3 }
  0x39   : > { %s4087_s23 = scalar_select %p3344_p7, 1, 0 }
  0x3a   : > { %s4086_s21 = scalar_select %p3338_p5, 1, 0 }
  0x3b   : > { %s2682_s13 = scalar_lea.hbm %s4088_s2, 16  ;;  %p3356_p9 = pneg %p3338_p5 }
  0x3c   : > { %p2683_p8 = scmp.ne.s32.totalorder %s4088_s2, %s2682_s13  ;;  %p2689_p13 = scmp.lt.u32.totalorder %s2682_s13, %s4088_s2 }
  0x3d   : > { %s4089_s7 = scalar_select %p3356_p9, 1, 0 }
  0x3e   : > { %p2685_p11 = pnand %p3356_p9, %p2683_p8 }
  0x40   : > { %p2686_p4 = pneg %p2685_p11 }
  0x42   : > { %p2691_p1 = pnand %p2689_p13, %p2686_p4 }
  0x44   : > { %2694 = shalt.err (!%p2691_p1)
}
  0x45   : > { %s2695_s24 = scalar_lea.vmem %s534_s15, 16  ;;  %s2702_s9 = scalar_lea.vmem %s534_s15, 32 }
  0x46   : > { %p2696_p2 = scmp.ne.s32.totalorder %s534_s15, %s2695_s24  ;;  %p2703_p10 = scmp.lt.s32.totalorder %s534_s15, %s534_s15 }
  0x47   : > { %p2704_p6 = scmp.lt.s32.totalorder %s2702_s9, %s2695_s24 }
  0x48   : > { %p2698_p3 = pnand %p2696_p2, %p3356_p9 }
  0x49   : > { %p2705_p0 = por %p2704_p6, %p2703_p10 }
  0x4a   : > { %p2699_p12 = pneg %p2698_p3 }
  0x4c   : > { %p2706_p7 = pnand %p2705_p0, %p2699_p12 }
  0x4e   : > { %2709 = shalt.err (!%p2706_p7)
}
  0x4f   : > { %2479 = dma.hbm_to_vmem [thread:$0]  (!%p3338_p5), %s4088_s2, 16, %s534_s15, [#allocation6]  }
  0x50   : > { %s53_s13 = sadd.s32 1, %s3110_s18  ;;  %s56_s0 = sadd.s32 1, %s3114_s19 }
  0x51   : > { %p54_p3 = scmp.ge.s32.totalorder %s53_s13, 2  ;;  %s3375_s17 = sand.u32 1, %s3118_s1  }
  0x52   : > { %s3378_s24 = sand.u32 1, %s3098_s29   ;;  %s3386_s27 = sshll.u32 %s3110_s18, 4 }
  0x53   : > { %s4171_s13 = smov (%p54_p3, %s53_s13), 0  ;;  %s4173_s0 = smov (!%p54_p3, %s56_s0), %s3114_s19 }
  0x54   : > { %4090 = sst [smem:[#allocation38_spill]] %s4171_s13  ;;  %s170_s9 = ssub.s32 %s3110_s18, %s4171_s13 }
  0x55   : > { %p58_p6 = scmp.ge.s32.totalorder %s4173_s0, 2  ;;  %p171_p10 = scmp.eq.s32.totalorder %s170_s9, 0 }
  0x56   : > { %s569_s15 = scalar_lea.vmem [#allocation8], %s3378_s24  ;;  %s4092_s2 = sadd.s32 1, %s3098_s29 }
  0x57   : > { %s576_s16 = sshll.u32 %s569_s15, 4  ;;  %s4175_s0 = smov (%p58_p6, %s4173_s0), 0  ;;  %s3408_s16 = int_to_ptr.vmem [resolvable:$true] %s576_s16 }
  0x58   : > { %4091 = sst [smem:[#allocation39_spill]] %s4175_s0  ;;  %s482_s30 = ssub.s32 %s3114_s19, %s4175_s0 }
  0x59   : > { %s3394_s1 = scalar_select %p171_p10, %s3098_s29, %s4092_s2  }
  0x5a   : > { %s4094_s5 = sld [smem:[#allocation46_spill]]  ;;  %p3404_p12 = scmp.eq.s32.totalorder %s482_s30, 0 }
  0x5b   : > { %4093 = sst [smem:[#allocation40_spill]] %s3394_s1  ;;  %p4096_p7 = scmp.ne.s32.totalorder %s4087_s23, 0 }
  0x5c   : > { %s4095_s9 = scalar_select %p3404_p12, 1, 0 }
  0x5d   : > { %p3415_p8 = pneg %p4096_p7 }
  0x60   : > { %s3402_s28 = scalar_lea.hbm %s4094_s5, %s3386_s27  ;;  %s2715_s30 = scalar_lea.hbm %s4094_s5, 32 }
  0x61   : > { %s2710_s13 = scalar_lea.hbm %s3402_s28, 16  ;;  %p2716_p13 = scmp.lt.u32.totalorder %s3402_s28, %s4094_s5 }
  0x62   : > { %p2711_p0 = scmp.ne.s32.totalorder %s3402_s28, %s2710_s13  ;;  %p2717_p1 = scmp.lt.u32.totalorder %s2715_s30, %s2710_s13 }
  0x63   : > { %p2719_p3 = scmp.lt.u32.totalorder %s2710_s13, %s3402_s28 }
  0x64   : > { %p2713_p11 = pnand %p3415_p8, %p2711_p0  ;;  %p2718_p2 = por %p2717_p1, %p2716_p13 }
  0x66   : > { %p2714_p4 = pneg %p2713_p11  ;;  %p2720_p6 = por %p2719_p3, %p2718_p2 }
  0x68   : > { %p2721_p10 = pnand %p2720_p6, %p2714_p4 }
  0x6a   : > { %2724 = shalt.err (!%p2721_p10)
}
  0x6b   : > { %s2725_s15 = scalar_lea.vmem %s3408_s16, 16  ;;  %s3121_s3 = smov [#allocation8]  }
  0x6c   : > { %p2726_p0 = scmp.ne.s32.totalorder %s3408_s16, %s2725_s15  ;;  %s2730_s25 = sshll.u32 %s3121_s3, 4  ;;  %s2731_s25 = int_to_ptr.vmem [resolvable:$false] %s2730_s25 }
  0x6d   : > { %s2732_s19 = scalar_lea.vmem %s2731_s25, 32  ;;  %p2733_p9 = scmp.lt.s32.totalorder %s3408_s16, %s2731_s25 }
  0x6e   : > { %p2728_p11 = pnand %p2726_p0, %p3415_p8  ;;  %p2734_p12 = scmp.lt.s32.totalorder %s2732_s19, %s2725_s15 }
  0x70   : > { %p2729_p5 = pneg %p2728_p11  ;;  %p2735_p13 = por %p2734_p12, %p2733_p9 }
  0x72   : > { %p2736_p1 = pnand %p2735_p13, %p2729_p5 }
  0x74   : > { %2739 = shalt.err (!%p2736_p1)
}
  0x75   : > { %s4098_s13 = scalar_lea.sflag [#allocation9], %s3375_s17  ;;  %s4099_s0 = sadd.s32 1, %s3086_s26 }
  0x76   : > { %2486 = dma.hbm_to_vmem [thread:$0]  (!%p4096_p7), %s3402_s28, 16, %s3408_s16, %s4098_s13  }
  0x77   : > { %p4100_p4 = scmp.ne.s32.totalorder %s4095_s9, 0  ;;  %s4101_s8 = sld [smem:[#allocation49_spill]] }
  0x78   : > { %s611_s19 = scalar_lea.vmem [#allocation11], %s3378_s24  ;;  %s4051_s18 = scalar_lea.sflag [#allocation12], %s3375_s17 }
  0x79   : > { %s3445_s15 = scalar_select %p4100_p4, %s3086_s26, %s4099_s0  }
  0x7a   : > { %s618_s5 = sshll.u32 %s611_s19, 4  ;;  %s619_s5 = int_to_ptr.vmem [resolvable:$true] %s618_s5 }
  0x7d   : > { %s3451_s25 = scalar_lea.hbm %s4101_s8, %s3386_s27  ;;  %s2745_s9 = scalar_lea.hbm %s4101_s8, 32 }
  0x7e   : > { %s2740_s1 = scalar_lea.hbm %s3451_s25, 16  ;;  %p2746_p2 = scmp.lt.u32.totalorder %s3451_s25, %s4101_s8 }
  0x7f   : > { %p2741_p5 = scmp.ne.s32.totalorder %s3451_s25, %s2740_s1  ;;  %p2747_p3 = scmp.lt.u32.totalorder %s2745_s9, %s2740_s1 }
  0x80   : > { %p2749_p10 = scmp.lt.u32.totalorder %s2740_s1, %s3451_s25 }
  0x81   : > { %p2743_p9 = pnand %p2741_p5, %p3415_p8  ;;  %p2748_p6 = por %p2747_p3, %p2746_p2 }
  0x83   : > { %p2744_p12 = pneg %p2743_p9  ;;  %p2750_p0 = por %p2749_p10, %p2748_p6 }
  0x85   : > { %p2751_p11 = pnand %p2750_p0, %p2744_p12 }
  0x87   : > { %2754 = shalt.err (!%p2751_p11)
}
  0x88   : > { %s2755_s30 = scalar_lea.vmem %s619_s5, 16  ;;  %s3122_s3 = smov [#allocation11]  }
  0x89   : > { %p2756_p13 = scmp.ne.s32.totalorder %s619_s5, %s2755_s30  ;;  %s2760_s19 = sshll.u32 %s3122_s3, 4  ;;  %s2761_s19 = int_to_ptr.vmem [resolvable:$false] %s2760_s19 }
  0x8a   : > { %s2762_s28 = scalar_lea.vmem %s2761_s19, 32  ;;  %p2763_p5 = scmp.lt.s32.totalorder %s619_s5, %s2761_s19 }
  0x8b   : > { %p2758_p1 = pnand %p2756_p13, %p3415_p8  ;;  %p2764_p9 = scmp.lt.s32.totalorder %s2762_s28, %s2755_s30 }
  0x8d   : > { %p2759_p4 = pneg %p2758_p1  ;;  %p2765_p7 = por %p2764_p9, %p2763_p5 }
  0x8f   : > { %p2766_p2 = pnand %p2765_p7, %p2759_p4 }
  0x91   : > { %2769 = shalt.err (!%p2766_p2)
}
  0x92   : > { %p4102_p3 = scmp.ne.s32.totalorder %s4087_s23, 0  ;;  %s4103_s11 = sld [smem:[#allocation52_spill]] }
  0x93   : > { %s653_s13 = scalar_lea.vmem [#allocation14], %s3378_s24  ;;  %s4052_s30 = scalar_lea.sflag [#allocation15], %s3375_s17 }
  0x94   : > { %2492 = dma.hbm_to_vmem [thread:$0]  (!%p4102_p3), %s3451_s25, 16, %s619_s5, %s4051_s18  }
  0x95   : > { %s660_s0 = sshll.u32 %s653_s13, 4  ;;  %s661_s0 = int_to_ptr.vmem [resolvable:$true] %s660_s0 }
  0x98   : > { %s3478_s9 = scalar_lea.hbm %s4103_s11, %s3386_s27  ;;  %s2775_s25 = scalar_lea.hbm %s4103_s11, 32 }
  0x99   : > { %s2770_s3 = scalar_lea.hbm %s3478_s9, 16  ;;  %p2776_p10 = scmp.lt.u32.totalorder %s3478_s9, %s4103_s11 }
  0x9a   : > { %p2771_p7 = scmp.ne.s32.totalorder %s3478_s9, %s2770_s3  ;;  %p2777_p0 = scmp.lt.u32.totalorder %s2775_s25, %s2770_s3 }
  0x9b   : > { %p2779_p13 = scmp.lt.u32.totalorder %s2770_s3, %s3478_s9 }
  0x9c   : > { %p2773_p12 = pnand %p2771_p7, %p3415_p8  ;;  %p2778_p11 = por %p2777_p0, %p2776_p10 }
  0x9e   : > { %p2774_p6 = pneg %p2773_p12  ;;  %p2780_p1 = por %p2779_p13, %p2778_p11 }
  0xa0   : > { %p2781_p4 = pnand %p2780_p1, %p2774_p6 }
  0xa2   : > { %2784 = shalt.err (!%p2781_p4)
}
  0xa3   : > { %s2785_s16 = scalar_lea.vmem %s661_s0, 16  ;;  %s3123_s13 = smov [#allocation14]  }
  0xa4   : > { %p2786_p5 = scmp.ne.s32.totalorder %s661_s0, %s2785_s16  ;;  %s2790_s18 = sshll.u32 %s3123_s13, 4  ;;  %s2791_s18 = int_to_ptr.vmem [resolvable:$false] %s2790_s18 }
  0xa5   : > { %s2792_s19 = scalar_lea.vmem %s2791_s18, 32  ;;  %p2793_p7 = scmp.lt.s32.totalorder %s661_s0, %s2791_s18 }
  0xa6   : > { %p2788_p9 = pnand %p2786_p5, %p3415_p8  ;;  %p2794_p12 = scmp.lt.s32.totalorder %s2792_s19, %s2785_s16 }
  0xa8   : > { %p2789_p2 = pneg %p2788_p9  ;;  %p2795_p3 = por %p2794_p12, %p2793_p7 }
  0xaa   : > { %p2796_p0 = pnand %p2795_p3, %p2789_p2 }
  0xac   : > { %2799 = shalt.err (!%p2796_p0)
}
  0xad   : > { %p4104_p10 = scmp.ne.s32.totalorder %s4087_s23, 0  ;;  %s3124_s3 = smov [#allocation2]  }
  0xae   : > { %s522_s5 = sshll.u32 %s3124_s3, 4  ;;  %s3125_s25 = smov [#allocation7]   ;;  %s523_s5 = int_to_ptr.vmem [resolvable:$true] %s522_s5 }
  0xaf   : > { %2498 = dma.hbm_to_vmem [thread:$0]  (!%p4104_p10), %s3478_s9, 16, %s661_s0, %s4052_s30  }
  0xb0   : > { %s547_s28 = sshll.u32 %s3125_s25, 4  ;;  %s4105_s16 = sld [smem:[#allocation42_spill]]  ;;  %s3501_s28 = int_to_ptr.vmem [resolvable:$true] %s547_s28 }
  0xb1   : > { %p4106_p6 = scmp.ne.s32.totalorder %s4089_s7, 0 }
  0xb6   : > { %s2800_s13 = scalar_lea.hbm %s4105_s16, 64 }
  0xb7   : > { %p2801_p3 = scmp.ne.s32.totalorder %s4105_s16, %s2800_s13  ;;  %p2807_p1 = scmp.lt.u32.totalorder %s2800_s13, %s4105_s16 }
  0xb9   : > { %p2803_p11 = pnand %p2801_p3, %p4106_p6 }
  0xbb   : > { %p2804_p13 = pneg %p2803_p11 }
  0xbd   : > { %p2809_p4 = pnand %p2807_p1, %p2804_p13 }
  0xbf   : > { %2812 = shalt.err (!%p2809_p4)
}
  0xc0   : > { %s2813_s0 = scalar_lea.vmem %s523_s5, 64  ;;  %p2821_p7 = scmp.lt.s32.totalorder %s523_s5, %s523_s5 }
  0xc1   : > { %p2814_p5 = scmp.ne.s32.totalorder %s523_s5, %s2813_s0  ;;  %p2822_p12 = scmp.lt.s32.totalorder %s2813_s0, %s2813_s0 }
  0xc3   : > { %p2816_p9 = pnand %p2814_p5, %p4106_p6  ;;  %p2823_p0 = por %p2822_p12, %p2821_p7 }
  0xc5   : > { %p2817_p2 = pneg %p2816_p9 }
  0xc7   : > { %p2824_p10 = pnand %p2823_p0, %p2817_p2 }
  0xc9   : > { %2827 = shalt.err (!%p2824_p10)
}
  0xca   : > { %p4107_p3 = scmp.ne.s32.totalorder %s4086_s21, 0  ;;  %s4108_s4 = sld [smem:[#allocation45_spill]] }
  0xcc   : > { %2476 = dma.hbm_to_vmem [thread:$0]  (!%p4107_p3), %s4105_s16, 64, %s523_s5, [#allocation3]  }
  0xd0   : > { %s2828_s1 = scalar_lea.hbm %s4108_s4, 16 }
  0xd1   : > { %p2829_p11 = scmp.ne.s32.totalorder %s4108_s4, %s2828_s1  ;;  %p2835_p10 = scmp.lt.u32.totalorder %s2828_s1, %s4108_s4 }
  0xd3   : > { %p2831_p13 = pnand %p2829_p11, %p4106_p6 }
  0xd5   : > { %p2832_p1 = pneg %p2831_p13 }
  0xd7   : > { %p2837_p4 = pnand %p2835_p10, %p2832_p1 }
  0xd9   : > { %2840 = shalt.err (!%p2837_p4)
}
  0xda   : > { %s2841_s5 = scalar_lea.vmem %s3501_s28, 16  ;;  %s2848_s0 = scalar_lea.vmem %s3501_s28, 32 }
  0xdb   : > { %p2842_p5 = scmp.ne.s32.totalorder %s3501_s28, %s2841_s5  ;;  %p2849_p7 = scmp.lt.s32.totalorder %s3501_s28, %s3501_s28 }
  0xdc   : > { %p2850_p12 = scmp.lt.s32.totalorder %s2848_s0, %s2841_s5 }
  0xdd   : > { %p2844_p9 = pnand %p2842_p5, %p4106_p6 }
  0xde   : > { %p2851_p0 = por %p2850_p12, %p2849_p7 }
  0xdf   : > { %p2845_p2 = pneg %p2844_p9 }
  0xe1   : > { %p2852_p11 = pnand %p2851_p0, %p2845_p2 }
  0xe3   : > { %2855 = shalt.err (!%p2852_p11)
}
  0xe4   : > { %2482 = dma.hbm_to_vmem [thread:$0]  (!%p4107_p3), %s4108_s4, 16, %s3501_s28, [#allocation6]  }
  0xe5   : > { %s4109_s6 = sld [smem:[#allocation47_spill]]  ;;  %s586_s1 = scalar_lea.vmem [#allocation10], %s3378_s24 }
  0xe6   : > { %s593_s21 = sshll.u32 %s586_s1, 4  ;;  %s4110_s10 = sld [smem:[#allocation51_spill]]  ;;  %s594_s21 = int_to_ptr.vmem [resolvable:$true] %s593_s21 }
  0xeb   : > { %s3549_s25 = scalar_lea.hbm %s4109_s6, %s3386_s27  ;;  %s2861_s0 = scalar_lea.hbm %s4109_s6, 32 }
  0xec   : > { %s3556_s19 = scalar_lea.hbm %s4110_s10, %s3386_s27  ;;  %s2856_s9 = scalar_lea.hbm %s3549_s25, 16 }
  0xed   : > { %p2857_p6 = scmp.ne.s32.totalorder %s3549_s25, %s2856_s9  ;;  %p2862_p1 = scmp.lt.u32.totalorder %s3549_s25, %s4109_s6 }
  0xee   : > { %p2863_p10 = scmp.lt.u32.totalorder %s2861_s0, %s2856_s9  ;;  %p2865_p5 = scmp.lt.u32.totalorder %s2856_s9, %s3549_s25 }
  0xef   : > { %p2859_p3 = pnand %p2857_p6, %p3415_p8 }
  0xf0   : > { %p2864_p4 = por %p2863_p10, %p2862_p1 }
  0xf1   : > { %p2860_p13 = pneg %p2859_p3 }
  0xf2   : > { %p2866_p9 = por %p2865_p5, %p2864_p4 }
  0xf4   : > { %p2867_p2 = pnand %p2866_p9, %p2860_p13 }
  0xf6   : > { %2870 = shalt.err (!%p2867_p2)
}
  0xf7   : > { %s2871_s7 = scalar_lea.vmem %s594_s21, 16  ;;  %s3126_s11 = smov [#allocation10]  }
  0xf8   : > { %p2872_p7 = scmp.ne.s32.totalorder %s594_s21, %s2871_s7  ;;  %s2876_s1 = sshll.u32 %s3126_s11, 4  ;;  %s2877_s1 = int_to_ptr.vmem [resolvable:$false] %s2876_s1 }
  0xf9   : > { %s2878_s18 = scalar_lea.vmem %s2877_s1, 32  ;;  %p2879_p11 = scmp.lt.s32.totalorder %s594_s21, %s2877_s1 }
  0xfa   : > { %p2874_p12 = pnand %p2872_p7, %p3415_p8  ;;  %p2880_p6 = scmp.lt.s32.totalorder %s2878_s18, %s2871_s7 }
  0xfc   : > { %p2875_p0 = pneg %p2874_p12  ;;  %p2881_p3 = por %p2880_p6, %p2879_p11 }
  0xfe   : > { %p2882_p1 = pnand %p2881_p3, %p2875_p0 }
 0x100   : > { %2885 = shalt.err (!%p2882_p1)
}
 0x101   : > { %p4111_p10 = scmp.ne.s32.totalorder %s4087_s23, 0  ;;  %s4112_s13 = scalar_lea.sflag [#allocation9], %s3375_s17 }
 0x102   : > { %s636_s9 = scalar_lea.vmem [#allocation13], %s3378_s24  ;;  %s3582_s8 = scalar_lea.hbm %s4015_s12, %s3386_s27 }
 0x103   : > { %2489 = dma.hbm_to_vmem [thread:$0]  (!%p4111_p10), %s3549_s25, 16, %s594_s21, %s4112_s13  }
 0x104   : > { %s643_s28 = sshll.u32 %s636_s9, 4  ;;  %s2886_s3 = scalar_lea.hbm %s3556_s19, 16  ;;  %s644_s28 = int_to_ptr.vmem [resolvable:$true] %s643_s28 }
 0x105   : > { %p2887_p13 = scmp.ne.s32.totalorder %s3556_s19, %s2886_s3  ;;  %s2891_s1 = scalar_lea.hbm %s4110_s10, 32 }
 0x106   : > { %p2892_p9 = scmp.lt.u32.totalorder %s3556_s19, %s4110_s10  ;;  %p2893_p2 = scmp.lt.u32.totalorder %s2891_s1, %s2886_s3 }
 0x107   : > { %p2889_p4 = pnand %p2887_p13, %p3415_p8  ;;  %p2895_p12 = scmp.lt.u32.totalorder %s2886_s3, %s3556_s19 }
 0x108   : > { %p2894_p7 = por %p2893_p2, %p2892_p9 }
 0x109   : > { %p2890_p5 = pneg %p2889_p4 }
 0x10a   : > { %p2896_p0 = por %p2895_p12, %p2894_p7 }
 0x10c   : > { %p2897_p11 = pnand %p2896_p0, %p2890_p5 }
 0x10e   : > { %2900 = shalt.err (!%p2897_p11)
}
 0x10f   : > { %s2901_s25 = scalar_lea.vmem %s644_s28, 16  ;;  %s3127_s21 = smov [#allocation13]  }
 0x110   : > { %p2902_p6 = scmp.ne.s32.totalorder %s644_s28, %s2901_s25  ;;  %s2906_s13 = sshll.u32 %s3127_s21, 4  ;;  %s2907_s13 = int_to_ptr.vmem [resolvable:$false] %s2906_s13 }
 0x111   : > { %s2908_s9 = scalar_lea.vmem %s2907_s13, 32  ;;  %p2909_p13 = scmp.lt.s32.totalorder %s644_s28, %s2907_s13 }
 0x112   : > { %p2904_p3 = pnand %p2902_p6, %p3415_p8  ;;  %p2910_p4 = scmp.lt.s32.totalorder %s2908_s9, %s2901_s25 }
 0x114   : > { %p2905_p1 = pneg %p2904_p3  ;;  %p2911_p10 = por %p2910_p4, %p2909_p13 }
 0x116   : > { %p2912_p2 = pnand %p2911_p10, %p2905_p1 }
 0x118   : > { %2915 = shalt.err (!%p2912_p2)
}
 0x119   : > { %p4113_p9 = scmp.ne.s32.totalorder %s4087_s23, 0  ;;  %s4114_s30 = scalar_lea.sflag [#allocation12], %s3375_s17 }
 0x11a   : > { %s670_s5 = scalar_lea.vmem [#allocation16], %s3378_s24  ;;  %s2916_s3 = scalar_lea.hbm %s3582_s8, 16 }
 0x11b   : > { %2495 = dma.hbm_to_vmem [thread:$0]  (!%p4113_p9), %s3556_s19, 16, %s644_s28, %s4114_s30  }
 0x11c   : > { %s677_s0 = sshll.u32 %s670_s5, 4  ;;  %p2917_p5 = scmp.ne.s32.totalorder %s3582_s8, %s2916_s3  ;;  %s678_s0 = int_to_ptr.vmem [resolvable:$true] %s677_s0 }
 0x11d   : > { %s2921_s1 = scalar_lea.hbm %s4015_s12, 32  ;;  %p2922_p12 = scmp.lt.u32.totalorder %s3582_s8, %s4015_s12 }
 0x11e   : > { %p2919_p10 = pnand %p2917_p5, %p3415_p8  ;;  %p2923_p0 = scmp.lt.u32.totalorder %s2921_s1, %s2916_s3 }
 0x11f   : > { %p2925_p6 = scmp.lt.u32.totalorder %s2916_s3, %s3582_s8 }
 0x120   : > { %p2920_p7 = pneg %p2919_p10  ;;  %p2924_p11 = por %p2923_p0, %p2922_p12 }
 0x122   : > { %p2926_p3 = por %p2925_p6, %p2924_p11 }
 0x124   : > { %p2927_p1 = pnand %p2926_p3, %p2920_p7 }
 0x126   : > { %2930 = shalt.err (!%p2927_p1)
}
 0x127   : > { %s2931_s19 = scalar_lea.vmem %s678_s0, 16  ;;  %s3128_s28 = smov [#allocation16]  }
 0x128   : > { %p2932_p13 = scmp.ne.s32.totalorder %s678_s0, %s2931_s19  ;;  %s2936_s21 = sshll.u32 %s3128_s28, 4  ;;  %s2937_s21 = int_to_ptr.vmem [resolvable:$false] %s2936_s21 }
 0x129   : > { %s2938_s13 = scalar_lea.vmem %s2937_s21, 32  ;;  %p2939_p5 = scmp.lt.s32.totalorder %s678_s0, %s2937_s21 }
 0x12a   : > { %p2934_p4 = pnand %p2932_p13, %p3415_p8  ;;  %p2940_p10 = scmp.lt.s32.totalorder %s2938_s13, %s2931_s19 }
 0x12c   : > { %p2935_p2 = pneg %p2934_p4  ;;  %p2941_p9 = por %p2940_p10, %p2939_p5 }
 0x12e   : > { %p2942_p0 = pnand %p2941_p9, %p2935_p2 }
 0x130   : > { %2945 = shalt.err (!%p2942_p0)
}
 0x131   : > { %p4115_p12 = scmp.ne.s32.totalorder %s4087_s23, 0  ;;  %s4116_s9 = scalar_lea.sflag [#allocation15], %s3375_s17 }
 0x132   : > { %s3627_s3 = scalar_lea.hbm %s4017_s14, %s3386_s27  ;;  %s695_s7 = scalar_lea.vmem [#allocation17], %s3378_s24 }
 0x133   : > { %2501 = dma.hbm_to_vmem [thread:$0]  (!%p4115_p12), %s3582_s8, 16, %s678_s0, %s4116_s9  }
 0x134   : > { %s702_s11 = sshll.u32 %s695_s7, 4  ;;  %s693_s1 = scalar_lea.sflag [#allocation18], %s3378_s24  ;;  %s703_s11 = int_to_ptr.vmem [resolvable:$true] %s702_s11 }
 0x135   : > { %s2946_s17 = scalar_lea.hbm %s3627_s3, 16  ;;  %s2951_s0 = scalar_lea.hbm %s4017_s14, 32 }
 0x136   : > { %p2947_p9 = scmp.ne.s32.totalorder %s3627_s3, %s2946_s17  ;;  %p2952_p6 = scmp.lt.u32.totalorder %s3627_s3, %s4017_s14 }
 0x137   : > { %p2953_p3 = scmp.lt.u32.totalorder %s2951_s0, %s2946_s17  ;;  %p2955_p13 = scmp.lt.u32.totalorder %s2946_s17, %s3627_s3 }
 0x138   : > { %p2949_p7 = pnand %p2947_p9, %p3415_p8 }
 0x139   : > { %p2954_p1 = por %p2953_p3, %p2952_p6 }
 0x13a   : > { %p2950_p11 = pneg %p2949_p7 }
 0x13b   : > { %p2956_p4 = por %p2955_p13, %p2954_p1 }
 0x13d   : > { %p2957_p2 = pnand %p2956_p4, %p2950_p11 }
 0x13f   : > { %2960 = shalt.err (!%p2957_p2)
}
 0x140   : > { %s2961_s24 = scalar_lea.vmem %s703_s11, 16  ;;  %s3129_s19 = smov [#allocation17]  }
 0x141   : > { %p2962_p5 = scmp.ne.s32.totalorder %s703_s11, %s2961_s24  ;;  %s2966_s28 = sshll.u32 %s3129_s19, 4  ;;  %s2967_s28 = int_to_ptr.vmem [resolvable:$false] %s2966_s28 }
 0x142   : > { %s2968_s21 = scalar_lea.vmem %s2967_s28, 32  ;;  %p2969_p9 = scmp.lt.s32.totalorder %s703_s11, %s2967_s28 }
 0x143   : > { %p2964_p10 = pnand %p2962_p5, %p3415_p8  ;;  %p2970_p7 = scmp.lt.s32.totalorder %s2968_s21, %s2961_s24 }
 0x145   : > { %p2965_p0 = pneg %p2964_p10  ;;  %p2971_p12 = por %p2970_p7, %p2969_p9 }
 0x147   : > { %p2972_p3 = pnand %p2971_p12, %p2965_p0 }
 0x149   : > { %2975 = shalt.err (!%p2972_p3)
}
 0x14a   : > { %p4117_p6 = scmp.ne.s32.totalorder %s4087_s23, 0  ;;  %p4118_p11 = scmp.ne.s32.totalorder %s4085_s22, 0 }
 0x14b   : > { %p4119_p1 = scmp.eq.s32.totalorder (!%p4118_p11), %s3294_s20, 0 }
 0x14c   : > { %2504 = dma.hbm_to_vmem [thread:$0]  (!%p4117_p6), %s3627_s3, 16, %s703_s11, %s693_s1  }
 0x14d   : > { %725 = sbr.rel (%p4118_p11) target bundleno = 3366 (0xd26), region = 88 }
 0x154   : > { %3049 = dma.done.wait (%p4119_p1), [#allocation3], 64   ;;  %p4120_p8 = pmov %p4119_p1 }
 0x155   : > { %p4121_p13 = pmov %p4119_p1 }
 0x156   : > { %3051 = vsyncadd (%p4120_p8), [#allocation3], 4294967232 }
 0x157   : > { %3053 = dma.done.wait (%p4121_p13), [#allocation6], 32   ;;  %p4122_p4 = pmov %p4119_p1 }
 0x158   : > { %s4123_s2 = sld [smem:[#allocation29_spill]]  ;;  %s4124_s23 = sld [smem:[#allocation35_spill]] }
 0x159   : > { %3055 = vsyncadd (%p4122_p4), [#allocation6], 4294967264  ;;  %s739_s13 = sand.u32 1, %s3294_s20  }
 0x15a   : > { %s740_s22 = scalar_lea.sflag [#allocation9], %s739_s13 }
 0x15e   : > { %s3660_s9 = sand.u32 1, %s4123_s2   ;;  %p4125_p12 = scmp.ne.s32.totalorder %s4124_s23, 0 }
 0x160   : > { %3057 = dma.done.wait (%p4125_p12), %s740_s22, 32  }
 0x161   : > { %3059 = vsyncadd (%p4125_p12), %s740_s22, 4294967264  ;;  %s756_s3 = scalar_lea.sflag [#allocation12], %s739_s13 }
 0x162   : > { %3061 = dma.done.wait (%p4125_p12), %s756_s3, 32  }
 0x163   : > { %3063 = vsyncadd (%p4125_p12), %s756_s3, 4294967264  ;;  %s772_s11 = scalar_lea.sflag [#allocation15], %s739_s13 }
 0x164   : > { %3065 = dma.done.wait (%p4125_p12), %s772_s11, 32  }
 0x165   : > { %3067 = vsyncadd (%p4125_p12), %s772_s11, 4294967264  ;;  %s788_s18 = scalar_lea.sflag [#allocation18], %s3660_s9 }
 0x166   : > { %3069 = dma.done.wait (%p4125_p12), %s788_s18, 16  }
 0x167   : > { %3071 = vsyncadd (%p4125_p12), %s788_s18, 4294967280  ;;  %s4126_s0 = sld [smem:[#allocation28_spill]]  ;;  %s4127_s25 = sld [smem:[#allocation31_spill]] }
 0x168   : > { %s4128_s27 = sld [smem:[#allocation30_spill]]  ;;  %s4130_s8 = sld [smem:[#allocation48_spill]] }
 0x169   : > { %s4129_s13 = sld [smem:[#allocation41_spill]]  ;;  %s4131_s1 = sld [smem:[#allocation50_spill]] }
 0x16a   : > { %s4132_s30 = sld [smem:[#allocation53_spill]] }
 0x16d   : > { %s4053_s24 = sand.u32 1, %s4126_s0   ;;  %p892_p2 = scmp.lt.s32.totalorder %s4127_s25, 1 }
 0x16e   : > { %s2265_s19 = sshll.u32 %s4053_s24, 4  ;;  %p897_p5 = scmp.lt.s32.totalorder %s4128_s27, 1 }
 0x16f   : > { %s4177_s25 = smov (!%p892_p2, %s4127_s25), 1  ;;  %s3724_s10 = scalar_lea.vmem [#allocation19], %s2265_s19 }
 0x170   : > { %s3693_s28 = scalar_select %p897_p5, %s4128_s27, 1 }
 0x171   : > { %s2306_s21 = sshll.u32 %s4177_s25, 4  ;;  %p2276_p10 = scmp.ne.s32.totalorder %s4128_s27, 0 }
 0x172   : > { %s896_s22 = scalar_lea.vmem %s4129_s13, %s2306_s21  ;;  %s2307_s3 = sshll.u32 %s3693_s28, 5  ;;  %v927_v0 = vld [vmem:[#allocation2] sm:$0xf] (!%p2276_p10)  ;;  %vm941_vm0 = vcmask (!%p2276_p10), 1041408   ;;  %v3130_v2 = vmov (!%p2276_p10), 0.0   ;;  %vm3131_vm1 = vmmov (!%p2276_p10), 0  }
 0x173   : > { %s3702_s17 = scalar_lea.vmem %s4130_s8, %s2307_s3  ;;  %s3707_s20 = scalar_lea.vmem %s4131_s1, %s2307_s3  ;;  %v925_v1 = vld [vmem:[%s896_s22] sm:$0xff] (!%p2276_p10)  ;;  %2347 = vmatprep.subr.bf16.mxu0 (!%p2276_p10), %v3130_v2  ;;  %v929_v3 = vpack.c.bf16 (!%p2276_p10), %v927_v0, %v927_v0  ;;  %2349 = vmatprep.mubr.msk.bf16.mxu0 (!%p2276_p10), %vm3131_vm1, %v3130_v2  ;;  %v926_v4 = vld [vmem:[%s896_s22 + $0x8] sm:$0xff] (!%p2276_p10)  ;;  %vm937_vm2 = vcmask (!%p2276_p10), 31744   ;;  %vm1002_vm3 = vcmask (!%p2276_p10), 261120  }
 0x174   : > { %s3712_s4 = scalar_lea.vmem %s4132_s30, %s2307_s3  ;;  %s2310_s25 = sshll.u32 %s3693_s28, 6  ;;  %2353 = vmatprep.subr.bf16.mxu1 (!%p2276_p10), %v3130_v2  ;;  %2357 = vmatprep.mubr.msk.bf16.mxu1 (!%p2276_p10), %vm3131_vm1, %v3130_v2  ;;  %v928_v6 = vpack.c.bf16 (!%p2276_p10), %v926_v4, %v925_v1  ;;  %v2277_v13 = vld [vmem:[#allocation5] ss:$0 sm:$0xff] (!%p2276_p10)  ;;  %v2279_v23 = vld [vmem:[#allocation7] ss:$0 sm:$0xff] (!%p2276_p10) }
 0x175   : > { %s4133_s21 = sld [smem:[#allocation54_spill]]  ;;  %s4134_s8 = sld [smem:[#allocation55_spill]]  ;;  %v943_v5 = vsel (!%p2276_p10), %vm941_vm0, %v929_v3, 0 }
 0x176   : > { %924 = sbr.rel (%p2276_p10) target bundleno = 814 (0x32e), region = 132  ;;  %2348 = vmatpush3.bf16.msra.mxu0 (!%p2276_p10), %v943_v5  ;;  %s4135_s5 = sld [smem:[#allocation44_spill]] (!%p2276_p10) }
 0x179   : > { %2350 = vmatmul.mubr.msk.bf16.vlgmr.msra.gmra.mrb[0].mxu0 (!%p2276_p10), %vm937_vm2, %v928_v6 }
 0x17b   : > { %s3718_s23 = scalar_lea.vmem %s4133_s21, %s2310_s25  ;;  %s919_s18 = scalar_lea.vmem %s4134_s8, %s3693_s28 }
 0x17c   : > { %v988_v7 = vld [vmem:[%s4135_s5] sm:$0xff] (!%p2276_p10)  ;;  %v989_v8 = vld [vmem:[%s4135_s5 + $0x8] sm:$0xff] (!%p2276_p10)  ;;  %v990_v10 = vld [vmem:[%s4135_s5 + $0x10] sm:$0xff] (!%p2276_p10) }
 0x17d   : > { %v993_v9 = vpack.c.bf16 %v989_v8, %v988_v7  ;;  %v991_v11 = vld [vmem:[%s4135_s5 + $0x18] sm:$0xff] }
 0x17e   : > { %v994_v12 = vpack.c.bf16 %v991_v11, %v990_v10 }
 0x17f   : > { %2354 = vmatpush3.bf16.msra.mxu1 %v993_v9 }
 0x180   : > { %2355 = vmatprep.subr.bf16.mxu1 %v3130_v2 }
 0x183   : > { %2356 = vmatpush3.bf16.msra.mxu1 %v994_v12 }
 0x24c   : > { %v979_v14 = vpop.f32.mrb[0].mxu0 }
 0x24d   : > { %v980_v15 = vadd.f32 %v2277_v13, %v979_v14  ;;  %v2351_v16 = vpop.f32.mrb[1].mxu0 }
 0x24e   : > { %v982_v17 = vpop.f32.mrb[2].mxu0 }
 0x24f   : > { %v983_v18 = vadd.f32 %v2277_v13, %v982_v17  ;;  %v2352_v19 = vpop.f32.mrb[3].mxu0  ;;  %v986_v20 = vmax.f32 %v980_v15, 0.0 }
 0x251   : > { %v987_v21 = vmax.f32 %v983_v18, 0.0 }
 0x253   : > { %v992_v22 = vpack.c.bf16 %v987_v21, %v986_v20 }
 0x255   : > { %2358 = vmatmul.mubr.msk.bf16.vlgmr.msra.gmra.mrb[0].mxu1 %vm1002_vm3, %v992_v22 }
 0x328   : > { %v1040_v24 = vpop.f32.mrb[0].mxu1 }
 0x329   : > { %v1041_v25 = vadd.f32 %v2279_v23, %v1040_v24  ;;  %v2359_v26 = vpop.f32.mrb[1].mxu1 }
 0x32a   : > { %v1043_v27 = vpop.f32.mrb[2].mxu1 }
 0x32b   : > { %1047 = vst.msk [vmem:[%s3724_s10] sm:$0xff] %vm1002_vm3, %v1041_v25  ;;  %v1044_v28 = vadd.f32 %v2279_v23, %v1043_v27  ;;  %v2360_v29 = vpop.f32.mrb[3].mxu1 }
 0x32d   : > { %1048 = vst.msk [vmem:[%s3724_s10 + $0x8] sm:$0xff] %vm1002_vm3, %v1044_v28 }
 0x32e PF: > { %vm1053_vm4 = vcmask 261120   ;;  %v1097_v44 = vld [vmem:[%s3702_s17] sm:$0xff]  ;;  %v1098_v45 = vld [vmem:[%s3702_s17 + $0x8] sm:$0xff]  ;;  %v3132_v47 = vmov 0.0   ;;  %v1099_v48 = vld [vmem:[%s3702_s17 + $0x10] sm:$0xff]  ;;  %vm3133_vm5 = vmmov 0   ;;  %v1155_v23 = vlaneseq }
 0x32f   : > { %v1102_v46 = vpack.c.bf16 %v1098_v45, %v1097_v44  ;;  %2361 = vmatprep.subr.bf16.mxu0 %v3132_v47  ;;  %v1100_v49 = vld [vmem:[%s3702_s17 + $0x18] sm:$0xff]  ;;  %2369 = vmatprep.subr.bf16.mxu1 %v3132_v47  ;;  %s4136_s17 = scalar_lea.vmem [#allocation8], %s3660_s9  ;;  %s4137_s3 = scalar_lea.vmem [#allocation10], %s3660_s9  ;;  %vm1183_vm6 = vcmask 64512   ;;  %vm1233_vm11 = vcmask 130048   ;;  %vm1701_vm13 = vcmask 195584  }
 0x330   : > { %v1103_v50 = vpack.c.bf16 %v1100_v49, %v1099_v48  ;;  %2365 = vmatprep.mubr.msk.bf16.mxu0 %vm3133_vm5, %v3132_v47  ;;  %2371 = vmatprep.mubr.msk.bf16.mxu1 %vm3133_vm5, %v3132_v47  ;;  %v2281_v59 = vld [vmem:[%s4136_s17] ss:$0 sm:$0xff]  ;;  %s4138_s0 = scalar_lea.vmem [#allocation11], %s3660_s9  ;;  %s3134_s25 = smov 88   ;;  %v1156_v24 = vshrl.u32 %v1155_v23, 7  ;;  %v1159_v25 = vand.u32 127, %v1155_v23 }
 0x331   : > { %2362 = vmatpush3.bf16.msra.mxu0 %v1102_v46  ;;  %v2282_v63 = vld [vmem:[%s4137_s3] ss:$0 sm:$0xff]  ;;  %s3135_s2 = smov 96   ;;  %s3136_s21 = smov 120   ;;  %vm1883_vm14 = vcmask 523264  }
 0x332   : > { %v3742_v30 = vld [vmem:[%s3724_s10] sm:$0xff]  ;;  %2363 = vmatprep.subr.bf16.mxu0 %v3132_v47  ;;  %v2283_v4 = vld [vmem:[%s4138_s0] ss:$0 sm:$0xff]  ;;  %s3137_s13 = smov 112   ;;  %s3138_s11 = smov 80   ;;  %v1157_v26 = vadd.s32 8, %v1156_v24  ;;  %vm1165_vm8 = vcmp.le.s32.totalorder %v1159_v25, %v1156_v24 }
 0x333   : > { %v1054_v32 = vsel %vm1053_vm4, %v3742_v30, 0.0  ;;  %s3139_s8 = smov 104   ;;  %s3140_s6 = smov 72   ;;  %vm1162_vm7 = vcmp.lt.s32.totalorder %v1159_v25, 8 }
 0x334   : > { %v3745_v31 = vld [vmem:[%s3724_s10 + $0x8] sm:$0xff]  ;;  %1055 = vadd.xlane.f32.xlu0 %v1054_v32  ;;  %vm1172_vm9 = vcmp.eq.s32.totalorder %v1159_v25, %v1157_v26  ;;  %vm3806_vm10 = vmand %vm1162_vm7, %vm1165_vm8  ;;  %s3141_s30 = smov 64   ;;  %s3142_s7 = smov 48  }
 0x335   : > { %v1057_v33 = vsel %vm1053_vm4, %v3745_v31, 0.0  ;;  %2364 = vmatpush3.bf16.msra.mxu0 %v1103_v50  ;;  %vm3810_vm12 = vmor %vm1162_vm7, %vm1172_vm9  ;;  %s3143_s1 = smov 40   ;;  %s3144_s27 = smov 56  }
 0x336   : > { %2375 = vmatprep.subr.bf16.mxu0 %v3132_v47  ;;  %s3145_s24 = smov 8   ;;  %s3146_s19 = smov 16  }
 0x337   : > { %s3147_s22 = smov 24   ;;  %s4145_s17 = scalar_lea.vmem [#allocation16], %s3660_s9 }
 0x338   : > { %1058 = vadd.xlane.f32.xlu0 %v1057_v33  ;;  %s4146_s3 = scalar_lea.vmem [#allocation17], %s3660_s9  ;;  %s4147_s0 = sld [smem:[#allocation31_spill]] }
 0x3c1   : > { %v1056_v34 = vpop.xlane.xlu0 %1055 }
 0x3c2   : > { %v1061_v35 = vmul.f32 0.03125, %v1056_v34 }
 0x3c4   : > { %v1063_v36 = vsub.f32 %v3742_v30, %v1061_v35 }
 0x3c5   : > { %v1059_v37 = vpop.xlane.xlu0 %1058 }
 0x3c6   : > { %v1062_v38 = vmul.f32 0.03125, %v1059_v37  ;;  %v1065_v39 = vmul.f32 %v1063_v36, %v1063_v36 }
 0x3c8   : > { %v1064_v40 = vsub.f32 %v3745_v31, %v1062_v38  ;;  %v1067_v41 = vsel %vm1053_vm4, %v1065_v39, 0.0 }
 0x3c9   : > { %1068 = vadd.xlane.f32.xlu1 %v1067_v41 }
 0x3ca   : > { %v1066_v42 = vmul.f32 %v1064_v40, %v1064_v40 }
 0x3cc   : > { %v1070_v43 = vsel %vm1053_vm4, %v1066_v42, 0.0 }
 0x3cd   : > { %1071 = vadd.xlane.f32.xlu1 %v1070_v43 }
 0x456   : > { %v1069_v51 = vpop.xlane.xlu1 %1068 }
 0x457   : > { %v1073_v52 = vmul.f32 0.03125, %v1069_v51 }
 0x459   : > { %v1075_v53 = vadd.f32 1e-05, %v1073_v52 }
 0x45a   : > { %v1072_v54 = vpop.xlane.xlu1 %1071 }
 0x45b   : > { %2642 = vrsqrt.f32 %v1075_v53  ;;  %v1074_v55 = vmul.f32 0.03125, %v1072_v54 }
 0x45d   : > { %v1076_v56 = vadd.f32 1e-05, %v1074_v55 }
 0x45f   : > { %2644 = vrsqrt.f32 %v1076_v56 }
 0x465   : > { %v2643_v57 = vpop.eup %2642 }
 0x466   : > { %v1079_v58 = vmul.f32 %v2643_v57, %v1063_v36 }
 0x468   : > { %v1087_v62 = vmul.f32 %v2281_v59, %v1079_v58 }
 0x469   : > { %v2645_v60 = vpop.eup %2644 }
 0x46a   : > { %v1080_v61 = vmul.f32 %v2645_v60, %v1064_v40  ;;  %v1095_v1 = vadd.f32 %v2282_v63, %v1087_v62 }
 0x46c   : > { %v1088_v0 = vmul.f32 %v2281_v59, %v1080_v61 }
 0x46e   : > { %v1096_v2 = vadd.f32 %v2282_v63, %v1088_v0 }
 0x470   : > { %v1101_v3 = vpack.c.bf16 %v1096_v2, %v1095_v1 }
 0x472   : > { %2366 = vmatmul.mubr.msk.bf16.vlgmr.msra.gmra.mrb[0].mxu0 %vm1053_vm4, %v1101_v3 }
 0x473   : > { %2377 = vmatprep.mubr.msk.bf16.mxu0 %vm3133_vm5, %v3132_v47 }
 0x545   : > { %v1148_v5 = vpop.f32.mrb[0].mxu0 }
 0x546   : > { %v2367_v6 = vpop.f32.mrb[1].mxu0  ;;  %v1149_v8 = vadd.f32 %v2283_v4, %v1148_v5 }
 0x547   : > { %v1151_v7 = vpop.f32.mrb[2].mxu0 }
 0x548   : > { %v1152_v9 = vadd.f32 %v2283_v4, %v1151_v7  ;;  %v2368_v10 = vpop.f32.mrb[3].mxu0 }
 0x54a   : > { %v3776_v11 = vpack.c.bf16 %v1152_v9, %v1149_v8 }
 0x54c   : > { %1306 = vrot.lane.b32.xlu1 %v3776_v11, %s3134_s25  ;;  %1181 = vrot.lane.b32.xlu0 %v3776_v11, %s3135_s2 }
 0x550   : > { %1304 = vrot.lane.b32.xlu1 %v3776_v11, %s3136_s21  ;;  %1427 = vrot.lane.b32.xlu0 %v3776_v11, %s3137_s13  ;;  %s4150_s21 = sld [smem:[#allocation36_spill]]  ;;  %s2311_s13 = sshll.u32 %s4147_s0, 8 }
 0x554   : > { %1429 = vrot.lane.b32.xlu1 %v3776_v11, %s3138_s11  ;;  %1550 = vrot.lane.b32.xlu0 %v3776_v11, %s3139_s8  ;;  %s1955_s11 = sshll.u32 %s3724_s10, 4  ;;  %s3935_s11 = int_to_ptr.vmem [resolvable:$true] %s1955_s11 }
 0x556   : > { %p4154_p9 = scmp.ne.s32.totalorder %s4150_s21, 0 }
 0x558   : > { %1552 = vrot.lane.b32.xlu1 %v3776_v11, %s3140_s6 }
 0x5be   : > { %v1182_v12 = vpop.permute.xlu0 %1181  ;;  %v1307_v14 = vpop.permute.xlu1 %1306 }
 0x5bf   : > { %v1188_v13 = vsel %vm1183_vm6, %v1182_v12, 0  ;;  %v1312_v16 = vsel %vm1183_vm6, %v1307_v14, 0 }
 0x5c0   : > { %2370 = vmatpush3.bf16.xpose.msra.mxu1 %v1188_v13 }
 0x5c1   : > { %2381 = vmatprep.subr.bf16.mxu1 %v3132_v47 }
 0x5c2   : > { %v1305_v15 = vpop.permute.xlu1 %1304  ;;  %v1428_v20 = vpop.permute.xlu0 %1427 }
 0x5c6   : > { %v1430_v17 = vpop.permute.xlu1 %1429  ;;  %v1551_v22 = vpop.permute.xlu0 %1550 }
 0x5c7   : > { %2372 = vmatmul.mubr.msk.bf16.vlgmr.msra.gmra.mrb[0].mxu1 %vm1183_vm6, %v3776_v11  ;;  %v1435_v18 = vsel %vm1183_vm6, %v1430_v17, 0 }
 0x5c8   : > { %2382 = vmatpush3.bf16.xpose.msra.mxu1 %v1312_v16  ;;  %2383 = vmatprep.mubr.msk.bf16.mxu1 %vm3133_vm5, %v3132_v47 }
 0x5c9   : > { %2393 = vmatprep.subr.bf16.mxu1 %v3132_v47 }
 0x5ca   : > { %v1553_v19 = vpop.permute.xlu1 %1552 }
 0x5cb   : > { %v1558_v21 = vsel %vm1183_vm6, %v1553_v19, 0 }
 0x5cf   : > { %2384 = vmatmul.mubr.msk.bf16.vlgmr.msra.gmra.mrb[4].mxu1 %vm1183_vm6, %v1305_v15 }
 0x5d0   : > { %2394 = vmatpush3.bf16.xpose.msra.mxu1 %v1435_v18  ;;  %2395 = vmatprep.mubr.msk.bf16.mxu1 %vm3133_vm5, %v3132_v47 }
 0x5d1   : > { %2405 = vmatprep.subr.bf16.mxu1 %v3132_v47 }
 0x5d7   : > { %2396 = vmatmul.mubr.msk.bf16.vlgmr.msra.gmra.mrb[8].mxu1 %vm1183_vm6, %v1428_v20 }
 0x5d8   : > { %2406 = vmatpush3.bf16.xpose.msra.mxu1 %v1558_v21  ;;  %2407 = vmatprep.mubr.msk.bf16.mxu1 %vm3133_vm5, %v3132_v47 }
 0x5d9   : > { %2417 = vmatprep.subr.bf16.mxu1 %v3132_v47 }
 0x5df   : > { %2408 = vmatmul.mubr.msk.bf16.vlgmr.msra.gmra.mrb[12].mxu1 %vm1183_vm6, %v1551_v22 }
 0x5e0   : > { %2421 = vmatprep.mubr.msk.bf16.mxu1 %vm3133_vm5, %v3132_v47 }
 0x69a   : > { %v1224_v28 = vpop.f32.mrb[0].mxu1 }
 0x69b   : > { %v1231_v32 = vsel %vm3806_vm10, %v1224_v28, -1e+09  ;;  %v2373_v33 = vpop.f32.mrb[1].mxu1 }
 0x69c   : > { %v1227_v34 = vpop.f32.mrb[2].mxu1  ;;  %v1234_v35 = vsel %vm1233_vm11, %v1231_v32, -inf }
 0x69d   : > { %v1232_v36 = vsel %vm3810_vm12, %v1227_v34, -1e+09  ;;  %1235 = vmax.xlane.f32.xlu1 %v1234_v35  ;;  %v2374_v37 = vpop.f32.mrb[3].mxu1 }
 0x69e   : > { %v1237_v38 = vsel %vm1233_vm11, %v1232_v36, -inf }
 0x69f   : > { %1238 = vmax.xlane.f32.xlu0 %v1237_v38 }
 0x6a2   : > { %v1348_v39 = vpop.f32.mrb[4].mxu1 }
 0x6a3   : > { %v1355_v40 = vsel %vm3806_vm10, %v1348_v39, -1e+09  ;;  %v2385_v41 = vpop.f32.mrb[5].mxu1 }
 0x6a4   : > { %v1351_v42 = vpop.f32.mrb[6].mxu1  ;;  %v1357_v43 = vsel %vm1233_vm11, %v1355_v40, -inf }
 0x6a5   : > { %v1356_v44 = vsel %vm3810_vm12, %v1351_v42, -1e+09  ;;  %1358 = vmax.xlane.f32.xlu0 %v1357_v43  ;;  %v2386_v45 = vpop.f32.mrb[7].mxu1 }
 0x6a6   : > { %v1360_v46 = vsel %vm1233_vm11, %v1356_v44, -inf }
 0x6a9   : > { %1361 = vmax.xlane.f32.xlu0 %v1360_v46 }
 0x6aa   : > { %v1471_v48 = vpop.f32.mrb[8].mxu1 }
 0x6ab   : > { %v1478_v49 = vsel %vm3806_vm10, %v1471_v48, -1e+09  ;;  %v2397_v50 = vpop.f32.mrb[9].mxu1 }
 0x6ac   : > { %v1474_v51 = vpop.f32.mrb[10].mxu1  ;;  %v1480_v52 = vsel %vm1233_vm11, %v1478_v49, -inf }
 0x6ad   : > { %v1479_v53 = vsel %vm3810_vm12, %v1474_v51, -1e+09  ;;  %1481 = vmax.xlane.f32.xlu1 %v1480_v52  ;;  %v2398_v54 = vpop.f32.mrb[11].mxu1 }
 0x6ae   : > { %v1483_v55 = vsel %vm1233_vm11, %v1479_v53, -inf }
 0x6af   : > { %1484 = vmax.xlane.f32.xlu0 %v1483_v55 }
 0x6b2   : > { %v1594_v56 = vpop.f32.mrb[12].mxu1 }
 0x6b3   : > { %v1601_v57 = vsel %vm3806_vm10, %v1594_v56, -1e+09  ;;  %v2409_v58 = vpop.f32.mrb[13].mxu1 }
 0x6b4   : > { %v1597_v59 = vpop.f32.mrb[14].mxu1  ;;  %v1603_v60 = vsel %vm1233_vm11, %v1601_v57, -inf }
 0x6b5   : > { %v1602_v61 = vsel %vm3810_vm12, %v1597_v59, -1e+09  ;;  %1604 = vmax.xlane.f32.xlu1 %v1603_v60  ;;  %v2410_v62 = vpop.f32.mrb[15].mxu1 }
 0x6b6   : > { %v1606_v63 = vsel %vm1233_vm11, %v1602_v61, -inf }
 0x6b7   : > { %1607 = vmax.xlane.f32.xlu0 %v1606_v63 }
 0x6c6   : > { %1257 = vrot.lane.b32.xlu1 %v3776_v11, %s3141_s30  ;;  %s4151_s30 = sld [smem:[#allocation56_spill]] }
 0x72a   : > { %v1236_v0 = vpop.xlane.xlu1 %1235 }
 0x72b   : > { %v1240_v1 = vsub.f32 %v1231_v32, %v1236_v0 }
 0x72c   : > { %v1239_v2 = vpop.xlane.xlu0 %1238 }
 0x72d   : > { %v1242_v3 = vmul.f32 1.442695, %v1240_v1  ;;  %v1241_v4 = vsub.f32 %v1232_v36, %v1239_v2 }
 0x72f   : > { %2646 = vpow2.f32 %v1242_v3  ;;  %v1244_v5 = vmul.f32 1.442695, %v1241_v4 }
 0x731   : > { %2648 = vpow2.f32 %v1244_v5 }
 0x732   : > { %v1359_v6 = vpop.xlane.xlu0 %1358 }
 0x733   : > { %v1363_v7 = vsub.f32 %v1355_v40, %v1359_v6 }
 0x735   : > { %v1365_v8 = vmul.f32 1.442695, %v1363_v7 }
 0x736   : > { %v1362_v9 = vpop.xlane.xlu0 %1361 }
 0x737   : > { %2650 = vpow2.f32 %v1365_v8  ;;  %v1364_v10 = vsub.f32 %v1356_v44, %v1362_v9 }
 0x739   : > { %v2647_v12 = vpop.eup %2646  ;;  %v1367_v13 = vmul.f32 1.442695, %v1364_v10 }
 0x73a   : > { %v1482_v14 = vpop.xlane.xlu1 %1481  ;;  %v1246_v15 = vsel %vm1233_vm11, %v2647_v12, 0.0 }
 0x73b   : > { %v2649_v16 = vpop.eup %2648  ;;  %2652 = vpow2.f32 %v1367_v13  ;;  %v1486_v17 = vsub.f32 %v1478_v49, %v1482_v14  ;;  %1247 = vadd.xlane.f32.xlu1 %v1246_v15 }
 0x73c   : > { %v1485_v18 = vpop.xlane.xlu0 %1484  ;;  %v1249_v19 = vsel %vm1233_vm11, %v2649_v16, 0.0 }
 0x73d   : > { %v1488_v20 = vmul.f32 1.442695, %v1486_v17  ;;  %v1487_v21 = vsub.f32 %v1479_v53, %v1485_v18  ;;  %1250 = vadd.xlane.f32.xlu0 %v1249_v19  ;;  %v1704_v19 = vld [vmem:[%s3707_s20] sm:$0xff] }
 0x73f   : > { %2654 = vpow2.f32 %v1488_v20  ;;  %v1490_v22 = vmul.f32 1.442695, %v1487_v21  ;;  %v1705_v20 = vld [vmem:[%s3707_s20 + $0x8] sm:$0xff] }
 0x741   : > { %v2651_v23 = vpop.eup %2650  ;;  %2656 = vpow2.f32 %v1490_v22 }
 0x742   : > { %v1605_v24 = vpop.xlane.xlu1 %1604  ;;  %v1369_v25 = vsel %vm1233_vm11, %v2651_v23, 0.0 }
 0x743   : > { %v1609_v26 = vsub.f32 %v1601_v57, %v1605_v24  ;;  %1370 = vadd.xlane.f32.xlu1 %v1369_v25  ;;  %v1706_v25 = vld [vmem:[%s3707_s20 + $0x10] sm:$0xff] }
 0x744   : > { %v1608_v27 = vpop.xlane.xlu0 %1607 }
 0x745   : > { %v2653_v28 = vpop.eup %2652  ;;  %v1611_v29 = vmul.f32 1.442695, %v1609_v26  ;;  %v1610_v32 = vsub.f32 %v1602_v61, %v1608_v27  ;;  %v1707_v26 = vld [vmem:[%s3707_s20 + $0x18] sm:$0xff]  ;;  %s4143_s20 = scalar_lea.vmem [#allocation13], %s3660_s9 }
 0x746   : > { %v1258_v33 = vpop.permute.xlu1 %1257  ;;  %v1372_v34 = vsel %vm1233_vm11, %v2653_v28, 0.0 }
 0x747   : > { %2658 = vpow2.f32 %v1611_v29  ;;  %v1613_v35 = vmul.f32 1.442695, %v1610_v32  ;;  %2376 = vmatpush3.bf16.msra.mxu0 %v1258_v33  ;;  %1373 = vadd.xlane.f32.xlu0 %v1372_v34 }
 0x748   : > { %2387 = vmatprep.subr.bf16.mxu0 %v3132_v47 }
 0x749   : > { %v2655_v36 = vpop.eup %2654  ;;  %2660 = vpow2.f32 %v1613_v35 }
 0x74a   : > { %v1492_v37 = vsel %vm1233_vm11, %v2655_v36, 0.0 }
 0x74b   : > { %v2657_v38 = vpop.eup %2656  ;;  %1493 = vadd.xlane.f32.xlu1 %v1492_v37 }
 0x74c   : > { %v1495_v39 = vsel %vm1233_vm11, %v2657_v38, 0.0 }
 0x74d   : > { %1496 = vadd.xlane.f32.xlu0 %v1495_v39 }
 0x751   : > { %v2659_v40 = vpop.eup %2658 }
 0x752   : > { %v1615_v41 = vsel %vm1233_vm11, %v2659_v40, 0.0 }
 0x753   : > { %v2661_v42 = vpop.eup %2660  ;;  %1616 = vadd.xlane.f32.xlu1 %v1615_v41 }
 0x754   : > { %v1618_v43 = vsel %vm1233_vm11, %v2661_v42, 0.0 }
 0x755   : > { %1619 = vadd.xlane.f32.xlu0 %v1618_v43 }
 0x764   : > { %1503 = vrot.lane.b32.xlu1 %v3776_v11, %s3142_s7  ;;  %s4152_s7 = smov %s4151_s30 }
 0x768   : > { %1626 = vrot.lane.b32.xlu1 %v3776_v11, %s3143_s1  ;;  %s3931_s1 = scalar_lea.hbm %s4151_s30, %s2311_s13 }
 0x76b   : > { %1380 = vrot.lane.b32.xlu0 %v3776_v11, %s3144_s27  ;;  %s2976_s27 = scalar_lea.vmem %s3935_s11, 256 }
 0x76c   : > { %p2977_p0 = scmp.ne.s32.totalorder %s3935_s11, %s2976_s27 }
 0x76e   : > { %p2978_p7 = pnand %p2977_p0, %p4154_p9 }
 0x770   : > { %p2979_p3 = pneg %p2978_p7 }
 0x7c8   : > { %v1248_v44 = vpop.xlane.xlu1 %1247 }
 0x7c9   : > { %2662 = vrcp.f32 %v1248_v44 }
 0x7ca   : > { %v1251_v45 = vpop.xlane.xlu0 %1250 }
 0x7cb   : > { %2664 = vrcp.f32 %v1251_v45 }
 0x7d0   : > { %v1371_v52 = vpop.xlane.xlu1 %1370 }
 0x7d3   : > { %v2663_v46 = vpop.eup %2662 }
 0x7d4   : > { %v1374_v48 = vpop.xlane.xlu0 %1373  ;;  %v1254_v50 = vmul.f32 %v2663_v46, %v2647_v12 }
 0x7d5   : > { %v2665_v49 = vpop.eup %2664  ;;  %2666 = vrcp.f32 %v1374_v48 }
 0x7d6   : > { %v1255_v51 = vmul.f32 %v2665_v49, %v2649_v16  ;;  %2668 = vrcp.f32 %v1371_v52 }
 0x7d8   : > { %v1256_v53 = vpack.c.bf16 %v1255_v51, %v1254_v50  ;;  %v1494_v11 = vpop.xlane.xlu1 %1493 }
 0x7da   : > { %2378 = vmatmul.mubr.msk.bf16.vlgmr.msra.gmra.mrb[4].mxu0 %vm1233_vm11, %v1256_v53  ;;  %v1497_v54 = vpop.xlane.xlu0 %1496 }
 0x7db   : > { %2389 = vmatprep.mubr.msk.bf16.mxu0 %vm3133_vm5, %v3132_v47  ;;  %2670 = vrcp.f32 %v1497_v54 }
 0x7dc   : > { %2672 = vrcp.f32 %v1494_v11 }
 0x7df   : > { %v2667_v55 = vpop.eup %2666 }
 0x7e0   : > { %v2669_v57 = vpop.eup %2668  ;;  %v1378_v58 = vmul.f32 %v2667_v55, %v2653_v28  ;;  %v1617_v59 = vpop.xlane.xlu1 %1616  ;;  %v1710_v28 = vpack.c.bf16 %v1707_v26, %v1706_v25 }
 0x7e1   : > { %v1377_v60 = vmul.f32 %v2669_v57, %v2651_v23  ;;  %v1709_v23 = vpack.c.bf16 %v1705_v20, %v1704_v19  ;;  %v1872_v19 = vld [vmem:[%s3718_s23 + $0x10] sm:$0xff] }
 0x7e2   : > { %v1620_v56 = vpop.xlane.xlu0 %1619 }
 0x7e3   : > { %2674 = vrcp.f32 %v1620_v56  ;;  %v1379_v62 = vpack.c.bf16 %v1378_v58, %v1377_v60  ;;  %2418 = vmatpush3.bf16.msra.mxu1 %v1709_v23  ;;  %v2294_v56 = vld [vmem:[%s4143_s20] ss:$0 sm:$0xff] }
 0x7e4   : > { %2676 = vrcp.f32 %v1617_v59  ;;  %v1504_v0 = vpop.permute.xlu1 %1503  ;;  %2419 = vmatprep.subr.bf16.mxu1 %v3132_v47 }
 0x7e5   : > { %v2671_v63 = vpop.eup %2670 }
 0x7e6   : > { %v1381_v61 = vpop.permute.xlu0 %1380  ;;  %v2673_v1 = vpop.eup %2672  ;;  %v1501_v2 = vmul.f32 %v2671_v63, %v2657_v38 }
 0x7e7   : > { %2388 = vmatpush3.bf16.msra.mxu0 %v1381_v61  ;;  %v1500_v3 = vmul.f32 %v2673_v1, %v2655_v36  ;;  %2420 = vmatpush3.bf16.msra.mxu1 %v1710_v28 }
 0x7e8   : > { %2399 = vmatprep.subr.bf16.mxu0 %v3132_v47  ;;  %v1627_v6 = vpop.permute.xlu1 %1626  ;;  %2433 = vmatprep.subr.bf16.mxu1 %v3132_v47 }
 0x7e9   : > { %v1502_v4 = vpack.c.bf16 %v1501_v2, %v1500_v3 }
 0x7ea   : > { %2390 = vmatmul.mubr.msk.bf16.vlgmr.msra.gmra.mrb[8].mxu0 %vm1233_vm11, %v1379_v62 }
 0x7eb   : > { %2400 = vmatpush3.bf16.msra.mxu0 %v1504_v0  ;;  %2401 = vmatprep.mubr.msk.bf16.mxu0 %vm3133_vm5, %v3132_v47 }
 0x7ec   : > { %2411 = vmatprep.subr.bf16.mxu0 %v3132_v47 }
 0x7ed   : > { %v2675_v5 = vpop.eup %2674 }
 0x7ee   : > { %v2677_v7 = vpop.eup %2676  ;;  %v1624_v8 = vmul.f32 %v2675_v5, %v2661_v42 }
 0x7ef   : > { %v1623_v9 = vmul.f32 %v2677_v7, %v2659_v40 }
 0x7f1   : > { %v1625_v10 = vpack.c.bf16 %v1624_v8, %v1623_v9 }
 0x7f2   : > { %2402 = vmatmul.mubr.msk.bf16.vlgmr.msra.gmra.mrb[12].mxu0 %vm1233_vm11, %v1502_v4 }
 0x7f3   : > { %2412 = vmatpush3.bf16.msra.mxu0 %v1627_v6  ;;  %2413 = vmatprep.mubr.msk.bf16.mxu0 %vm3133_vm5, %v3132_v47 }
 0x7f4   : > { %2425 = vmatprep.subr.bf16.mxu0 %v3132_v47 }
 0x7fa   : > { %2414 = vmatmul.mubr.msk.bf16.vlgmr.msra.gmra.mrb[16].mxu0 %vm1233_vm11, %v1625_v10  ;;  %v1810_v10 = vld [vmem:[%s3712_s4] sm:$0xff] }
 0x7fb   : > { %2429 = vmatprep.mubr.msk.bf16.mxu0 %vm3133_vm5, %v3132_v47 }
 0x8ad   : > { %v1297_v12 = vpop.f32.mrb[4].mxu0 }
 0x8ae   : > { %v2379_v13 = vpop.f32.mrb[5].mxu0 }
 0x8af   : > { %v1300_v14 = vpop.f32.mrb[6].mxu0 }
 0x8b0   : > { %v2380_v15 = vpop.f32.mrb[7].mxu0 }
 0x8b1   : > { %v1813_v15 = vld [vmem:[%s3712_s4 + $0x18] sm:$0xff] }
 0x8bd   : > { %v1420_v16 = vpop.f32.mrb[8].mxu0 }
 0x8be   : > { %v2391_v17 = vpop.f32.mrb[9].mxu0 }
 0x8bf   : > { %v1423_v18 = vpop.f32.mrb[10].mxu0  ;;  %v1870_v17 = vld [vmem:[%s3718_s23] sm:$0xff] }
 0x8c0   : > { %v2627_v21 = vpack.i.bf16 %v1423_v18, %v1420_v16  ;;  %v2392_v22 = vpop.f32.mrb[11].mxu0  ;;  %v1871_v18 = vld [vmem:[%s3718_s23 + $0x8] sm:$0xff] }
 0x8c1   : > { %v1879_v20 = vpack.c.bf16 %v1871_v18, %v1870_v17 }
 0x8c2   : > { %2628 = vrot.lane.b32.xlu1 %v2627_v21, %s3145_s24  ;;  %v1873_v21 = vld [vmem:[%s3718_s23 + $0x18] sm:$0xff] }
 0x8c3   : > { %v1880_v22 = vpack.c.bf16 %v1873_v21, %v1872_v19 }
 0x8c5   : > { %v1543_v24 = vpop.f32.mrb[12].mxu0 }
 0x8c6   : > { %v2403_v27 = vpop.f32.mrb[13].mxu0 }
 0x8c7   : > { %v1546_v29 = vpop.f32.mrb[14].mxu0 }
 0x8c8   : > { %v2632_v32 = vpack.i.bf16 %v1546_v29, %v1543_v24  ;;  %v2404_v33 = vpop.f32.mrb[15].mxu0 }
 0x8ca   : > { %2633 = vrot.lane.b32.xlu0 %v2632_v32, %s3146_s19  ;;  %s3148_s19 = smov [#allocation19]  }
 0x8cd   : > { %v1666_v34 = vpop.f32.mrb[16].mxu0 }
 0x8ce   : > { %v2415_v35 = vpop.f32.mrb[17].mxu0 }
 0x8cf   : > { %v1669_v36 = vpop.f32.mrb[18].mxu0 }
 0x8d0   : > { %v2637_v37 = vpack.i.bf16 %v1669_v36, %v1666_v34  ;;  %v2416_v38 = vpop.f32.mrb[19].mxu0 }
 0x8d2   : > { %2638 = vrot.lane.b32.xlu1 %v2637_v37, %s3147_s22  ;;  %v2296_v37 = vld [vmem:[%s4145_s17] ss:$0 sm:$0xff]  ;;  %s2980_s22 = sshll.u32 %s3148_s19, 4  ;;  %s2981_s22 = int_to_ptr.vmem [resolvable:$false] %s2980_s22 }
 0x8d3   : > { %s2982_s20 = scalar_lea.vmem %s2981_s22, 512  ;;  %p2983_p6 = scmp.lt.s32.totalorder %s3935_s11, %s2981_s22 }
 0x8d4   : > { %p2984_p11 = scmp.lt.s32.totalorder %s2982_s20, %s2976_s27 }
 0x8d6   : > { %p2985_p1 = por %p2984_p11, %p2983_p6 }
 0x8d8   : > { %p2986_p8 = pnand %p2985_p1, %p2979_p3 }
 0x934   : > { %v2629_v39 = vpop.permute.xlu1 %2628 }
 0x935   : > { %v2631_v41 = vunpack.i.h.bf16 %v2629_v39  ;;  %v2630_v42 = vunpack.i.l.bf16 %v2629_v39 }
 0x937   : > { %v1698_v46 = vsel %vm1183_vm6, %v1300_v14, %v2631_v41  ;;  %v1697_v48 = vsel %vm1183_vm6, %v1297_v12, %v2630_v42  ;;  %v1811_v12 = vld [vmem:[%s3712_s4 + $0x8] sm:$0xff]  ;;  %v1812_v14 = vld [vmem:[%s3712_s4 + $0x10] sm:$0xff]  ;;  %s4144_s4 = scalar_lea.vmem [#allocation14], %s3660_s9  ;;  %v1874_v42 = vld [vmem:[%s3718_s23 + $0x20] sm:$0xff] }
 0x938   : > { %v1815_v13 = vpack.c.bf16 %v1811_v12, %v1810_v10  ;;  %v1816_v16 = vpack.c.bf16 %v1813_v15, %v1812_v14  ;;  %v2295_v33 = vld [vmem:[%s4144_s4] ss:$0 sm:$0xff] }
 0x93a   : > { %2426 = vmatpush3.bf16.msra.mxu0 %v1815_v13 }
 0x93b   : > { %2427 = vmatprep.subr.bf16.mxu0 %v3132_v47 }
 0x93c   : > { %v2634_v40 = vpop.permute.xlu0 %2633 }
 0x93d   : > { %v2636_v43 = vunpack.i.h.bf16 %v2634_v40  ;;  %v2635_v44 = vunpack.i.l.bf16 %v2634_v40 }
 0x93e   : > { %2428 = vmatpush3.bf16.msra.mxu0 %v1816_v16 }
 0x93f   : > { %v1700_v51 = vsel %vm1233_vm11, %v1698_v46, %v2636_v43  ;;  %v1699_v52 = vsel %vm1233_vm11, %v1697_v48, %v2635_v44  ;;  %v1875_v43 = vld [vmem:[%s3718_s23 + $0x28] sm:$0xff]  ;;  %v1877_v46 = vld [vmem:[%s3718_s23 + $0x38] sm:$0xff] }
 0x940   : > { %v1881_v44 = vpack.c.bf16 %v1875_v43, %v1874_v42 }
 0x944   : > { %v2639_v45 = vpop.permute.xlu1 %2638 }
 0x945   : > { %v2641_v49 = vunpack.i.h.bf16 %v2639_v45  ;;  %v2640_v50 = vunpack.i.l.bf16 %v2639_v45  ;;  %v1876_v45 = vld [vmem:[%s3718_s23 + $0x30] sm:$0xff]  ;;  %s4148_s23 = sld [smem:[#allocation28_spill]] }
 0x946   : > { %v1882_v48 = vpack.c.bf16 %v1877_v46, %v1876_v45 }
 0x947   : > { %v1703_v53 = vsel %vm1701_vm13, %v1700_v51, %v2641_v49  ;;  %v1702_v54 = vsel %vm1701_vm13, %v1699_v52, %v2640_v50  ;;  %v2297_v49 = vld [vmem:[%s4146_s3] ss:$0 sm:$0xff] }
 0x948   : > { %v1708_v11 = vpack.c.bf16 %v1703_v53, %v1702_v54 }
 0x94a   : > { %2422 = vmatmul.mubr.msk.bf16.vlgmr.msra.gmra.mrb[16].mxu1 %vm1053_vm4, %v1708_v11 }
 0x94b   : > { %2441 = vmatprep.mubr.msk.bf16.mxu1 %vm3133_vm5, %v3132_v47  ;;  %2434 = vmatpush3.bf16.msra.mxu1 %v1879_v20  ;;  %s4153_s28 = sand.u32 1, %s4148_s23  }
 0x94c   : > { %2435 = vmatprep.subr.bf16.mxu1 %v3132_v47 }
 0x94f   : > { %2436 = vmatpush3.bf16.msra.mxu1 %v1880_v22 }
 0x950   : > { %2437 = vmatprep.subr.bf16.mxu1 %v3132_v47 }
 0x953   : > { %2438 = vmatpush3.bf16.msra.mxu1 %v1881_v44 }
 0x954   : > { %2439 = vmatprep.subr.bf16.mxu1 %v3132_v47 }
 0x957   : > { %2440 = vmatpush3.bf16.msra.mxu1 %v1882_v48 }
 0xa1d   : > { %v1748_v55 = vpop.f32.mrb[16].mxu1 }
 0xa1e   : > { %v1755_v57 = vadd.f32 %v1748_v55, %v3742_v30  ;;  %v2423_v58 = vpop.f32.mrb[17].mxu1 }
 0xa1f   : > { %v1751_v59 = vpop.f32.mrb[18].mxu1  ;;  %v2300_v58 = vld [vmem:[%s919_s18] ss:$0 sm:$0xff]  ;;  %s3941_s18 = scalar_lea.sflag [#allocation4], %s4153_s28 }
 0xa20   : > { %v3883_v60 = vadd.f32 %v2294_v56, %v1755_v57  ;;  %v1756_v61 = vadd.f32 %v1751_v59, %v3745_v31  ;;  %v2424_v62 = vpop.f32.mrb[19].mxu1 }
 0xa22   : > { %v3886_v63 = vadd.f32 %v2294_v56, %v1756_v61  ;;  %v1768_v0 = vsel %vm1053_vm4, %v3883_v60, 0.0 }
 0xa23   : > { %1769 = vadd.xlane.f32.xlu0 %v1768_v0 }
 0xa24   : > { %v1771_v1 = vsel %vm1053_vm4, %v3886_v63, 0.0 }
 0xa25   : > { %1772 = vadd.xlane.f32.xlu1 %v1771_v1 }
 0xab0   : > { %v1770_v30 = vpop.xlane.xlu0 %1769 }
 0xab1   : > { %v1774_v2 = vmul.f32 0.03125, %v1770_v30 }
 0xab2   : > { %v1773_v3 = vpop.xlane.xlu1 %1772 }
 0xab3   : > { %v1776_v31 = vsub.f32 %v3883_v60, %v1774_v2  ;;  %v1775_v4 = vmul.f32 0.03125, %v1773_v3 }
 0xab5   : > { %v1777_v5 = vsub.f32 %v3886_v63, %v1775_v4  ;;  %v1778_v6 = vmul.f32 %v1776_v31, %v1776_v31 }
 0xab7   : > { %v1780_v7 = vsel %vm1053_vm4, %v1778_v6, 0.0  ;;  %v1779_v8 = vmul.f32 %v1777_v5, %v1777_v5 }
 0xab8   : > { %1781 = vadd.xlane.f32.xlu0 %v1780_v7 }
 0xab9   : > { %v1783_v9 = vsel %vm1053_vm4, %v1779_v8, 0.0 }
 0xabc   : > { %1784 = vadd.xlane.f32.xlu0 %v1783_v9 }
 0xb45   : > { %v1782_v23 = vpop.xlane.xlu0 %1781 }
 0xb46   : > { %v1786_v24 = vmul.f32 0.03125, %v1782_v23 }
 0xb48   : > { %v1788_v25 = vadd.f32 1e-05, %v1786_v24 }
 0xb49   : > { %v1785_v26 = vpop.xlane.xlu0 %1784 }
 0xb4a   : > { %2678 = vrsqrt.f32 %v1788_v25  ;;  %v1787_v27 = vmul.f32 0.03125, %v1785_v26 }
 0xb4c   : > { %v1789_v28 = vadd.f32 1e-05, %v1787_v27 }
 0xb4e   : > { %2680 = vrsqrt.f32 %v1789_v28 }
 0xb54   : > { %v2679_v29 = vpop.eup %2678 }
 0xb55   : > { %v1792_v32 = vmul.f32 %v2679_v29, %v1776_v31 }
 0xb57   : > { %v1800_v35 = vmul.f32 %v2295_v33, %v1792_v32 }
 0xb58   : > { %v2681_v34 = vpop.eup %2680 }
 0xb59   : > { %v1793_v36 = vmul.f32 %v2681_v34, %v1777_v5  ;;  %v1808_v39 = vadd.f32 %v2296_v37, %v1800_v35 }
 0xb5b   : > { %v1801_v38 = vmul.f32 %v2295_v33, %v1793_v36 }
 0xb5d   : > { %v1809_v40 = vadd.f32 %v2296_v37, %v1801_v38 }
 0xb5f   : > { %v1814_v41 = vpack.c.bf16 %v1809_v40, %v1808_v39 }
 0xb61   : > { %2430 = vmatmul.mubr.msk.bf16.vlgmr.msra.gmra.mrb[20].mxu0 %vm1053_vm4, %v1814_v41 }
 0xc34   : > { %v1861_v50 = vpop.f32.mrb[20].mxu0 }
 0xc35   : > { %v1862_v51 = vadd.f32 %v2297_v49, %v1861_v50  ;;  %v2431_v52 = vpop.f32.mrb[21].mxu0 }
 0xc36   : > { %v1864_v53 = vpop.f32.mrb[22].mxu0 }
 0xc37   : > { %v1865_v54 = vadd.f32 %v2297_v49, %v1864_v53  ;;  %v2432_v11 = vpop.f32.mrb[23].mxu0  ;;  %v1868_v55 = vmax.f32 %v1862_v51, 0.0 }
 0xc39   : > { %v1869_v56 = vmax.f32 %v1865_v54, 0.0 }
 0xc3b   : > { %v1878_v47 = vpack.c.bf16 %v1869_v56, %v1868_v55 }
 0xc3d   : > { %2442 = vmatmul.mubr.msk.bf16.vlgmr.msra.gmra.mrb[20].mxu1 %vm1883_vm14, %v1878_v47 }
 0xd10   : > { %v1921_v57 = vpop.f32.mrb[20].mxu1 }
 0xd11   : > { %v1928_v59 = vadd.f32 %v1921_v57, %v3883_v60  ;;  %v2443_v61 = vpop.f32.mrb[21].mxu1 }
 0xd12   : > { %v1924_v62 = vpop.f32.mrb[22].mxu1 }
 0xd13   : > { %v1937_v0 = vadd.f32 %v2300_v58, %v1928_v59  ;;  %v1929_v1 = vadd.f32 %v1924_v62, %v3886_v63  ;;  %v2444_v30 = vpop.f32.mrb[23].mxu1 }
 0xd15   : > { %1939 = vst.msk [vmem:[%s3724_s10] sm:$0xff] %vm1053_vm4, %v1937_v0  ;;  %v1938_v2 = vadd.f32 %v2300_v58, %v1929_v1 }
 0xd17   : > { %1940 = vst.msk [vmem:[%s3724_s10 + $0x8] sm:$0xff] %vm1053_vm4, %v1938_v2 }
 0xd18   : > { %2989 = shalt.err (!%p2986_p8)
}
 0xd19   : > { %s2990_s10 = scalar_lea.hbm %s3931_s1, 256  ;;  %s2994_s3 = scalar_lea.hbm %s4152_s7, 512 }
 0xd1a   : > { %p2991_p13 = scmp.ne.s32.totalorder %s3931_s1, %s2990_s10  ;;  %p2995_p2 = scmp.lt.u32.totalorder %s3931_s1, %s4152_s7 }
 0xd1b   : > { %p2996_p5 = scmp.lt.u32.totalorder %s2994_s3, %s2990_s10  ;;  %p2998_p0 = scmp.lt.u32.totalorder %s2990_s10, %s3931_s1 }
 0xd1c   : > { %p2992_p4 = pnand %p2991_p13, %p4154_p9 }
 0xd1d   : > { %p2997_p10 = por %p2996_p5, %p2995_p2 }
 0xd1e   : > { %p2993_p12 = pneg %p2992_p4 }
 0xd1f   : > { %p2999_p7 = por %p2998_p0, %p2997_p10 }
 0xd21   : > { %p3000_p3 = pnand %p2999_p7, %p2993_p12 }
 0xd23   : > { %3003 = shalt.err (!%p3000_p3)
}
 0xd24   : > { %s3149_s25 = smov 128  }
 0xd25   : > { %2471 = dma.vmem_to_hbm [thread:$0]  (%p4154_p9), %s3935_s11, 256, %s3931_s1, %s3941_s18, %s3149_s25, %s3149_s25, %s3145_s24  }
 0xd26 PF: > { %s4155_s9 = sld [smem:[#allocation34_spill]]  ;;  %s4156_s2 = sld [smem:[#allocation27_spill]] }
 0xd27   : > { %s4157_s13 = sld [smem:[#allocation37_spill]] }
 0xd2c   : > { %p2516_p6 = scmp.ge.s32.totalorder %s4155_s9, 2  ;;  %s1970_s8 = sand.u32 1, %s4156_s2  }
 0xd2d   : > { %p4158_p11 = scmp.ne.s32.totalorder %s4157_s13, 0  ;;  %s1971_s6 = scalar_lea.sflag [#allocation4], %s1970_s8 }
 0xd2f   : > { %p2506_p1 = pnand %p2516_p6, %p4158_p11 }
 0xd31   : > { %3073 = dma.done.wait (!%p2506_p1), %s1971_s6, 256  }
 0xd32   : > { %3075 = vsyncadd (!%p2506_p1), %s1971_s6, 4294967040  ;;  %s44_s1 = sadd.s32 1, %s4155_s9   ;;  %s4159_s24 = sld [smem:[#allocation28_spill]] }
 0xd33   : > { %p41_p8 = scmp.ge.s32.totalorder %s44_s1, 6   ;;  %s4160_s27 = sld [smem:[#allocation29_spill]] }
 0xd34   : > { %s4161_s21 = sld [smem:[#allocation40_spill]]  ;;  %s4162_s0 = sld [smem:[#allocation32_spill]] }
 0xd35   : > { %s4163_s30 = sld [smem:[#allocation33_spill]]  ;;  %s4164_s18 = sld [smem:[#allocation38_spill]] }
 0xd36   : > { %s4165_s19 = sld [smem:[#allocation39_spill]]  ;;  %s4166_s25 = smov %s3086_s26 }
 0xd37   : > { %s4167_s26 = smov %s3445_s15  ;;  %s4168_s28 = smov %s3098_s29 }
 0xd38   :  { %43 = sbr.rel (!%p41_p8) target bundleno = 34 (0x22), region = 240 }
 0xd3a   : > { %s4169_s29 = smov %s4161_s21 }
 0xd3f   :  { %1976 = vsyncpa [#allocation3], 1 }
 0xd40   :  { %1978 = vsyncpa [#allocation3 + $0x1], 1 }
 0xd41   :  { %1979 = vsyncpa [#allocation6], 1 }
 0xd42   :  { %1980 = vsyncpa [#allocation9], 1 }
 0xd43   :  { %1982 = vsyncpa [#allocation9 + $0x1], 1 }
 0xd44   :  { %1983 = vsyncpa [#allocation12], 1 }
 0xd45   :  { %1985 = vsyncpa [#allocation12 + $0x1], 1 }
 0xd46   :  { %1986 = vsyncpa [#allocation15], 1 }
 0xd47   :  { %1988 = vsyncpa [#allocation15 + $0x1], 1 }
 0xd48   :  { %1989 = vsyncpa [#allocation18], 1 }
 0xd49   :  { %1991 = vsyncpa [#allocation18 + $0x1], 1 }
 0xd4a   :  { %1992 = vsyncpa [#allocation4], 1 }
 0xd4b   :  { %1994 = vsyncpa [#allocation4 + $0x1], 1 }

</bundles_post_ra>
